<compile_context>
chip_gen: v6e
topology: v6e:2x2x1
jax: 0.10.0
libtpu: 0.0.40
codegen_flags: <defaults>
</compile_context>

<pallas_src>
import jax
import jax.numpy as jnp
from jax.experimental import pallas as pl
from jax.experimental.pallas import tpu as pltpu

NUM_CLASSES = 10
HIDDEN = 512
K_IN = 28 * 28        # 784, left unpadded (ragged K handled by Mosaic)
OUT_PAD = 128         # lane-dense logits tile; real classes live in [:, :NUM_CLASSES]


def _round_up(x, m):
    return ((x + m - 1) // m) * m


def mlp_kernel(x_ref, w1_ref, b1_ref, w2_ref, b2_ref, w3_ref, b3_ref, o_ref):
    """Fused 3-layer MLP on one (TB, K_IN) bf16 batch tile.

    Weights are bf16 (MXU-native on v5e/v6e/v7x); hidden activations are cast
    to bf16 only at the dot inputs so bias-add / ReLU run in f32 on the VPU;
    all matmuls accumulate in f32.
    """
    h1 = jnp.dot(x_ref[...], w1_ref[...], preferred_element_type=jnp.float32)
    h1 = jnp.maximum(h1 + b1_ref[...], 0.0)
    h2 = jnp.dot(h1.astype(jnp.bfloat16), w2_ref[...],
                 preferred_element_type=jnp.float32)
    h2 = jnp.maximum(h2 + b2_ref[...], 0.0)
    logits = jnp.dot(h2.astype(jnp.bfloat16), w3_ref[...],
                     preferred_element_type=jnp.float32)
    o_ref[...] = (logits + b3_ref[...]).astype(o_ref.dtype)     # (TB, OUT_PAD)


def neural_network_forward(x_nchw, params, num_classes=NUM_CLASSES):
    """x_nchw: (B, 1, 28, 28). Returns logits (B, num_classes) float32."""
    w1, b1, w2, b2, w3, b3 = params
    B = x_nchw.shape[0]
    # nn.Flatten + single bf16 cast (half the input DMA bytes, no K padding).
    x2d = x_nchw.reshape(B, K_IN).astype(jnp.bfloat16)

    # Batch-tile selection:
    #  - B >= 1024: 512-row tiles (better DMA efficiency on mem-bound v6e)
    #  - B >= 128 : guarantee >= 2 grid steps so the "parallel" batch axis
    #               actually splits across both v7x TensorCores
    #  - tiny B   : single tile rounded up to the bf16 sublane pack (16)
    if B >= 1024:
        TB = 512
    elif B >= 256:
        TB = 128
    elif B >= 128:
        TB = 64
    else:
        TB = _round_up(B, 16)
    B_pad = _round_up(B, TB)
    if B_pad != B:
        x2d = jnp.pad(x2d, ((0, B_pad - B), (0, 0)))
    grid = (B_pad // TB,)

    # Weight-stationary: constant index_map keeps the ~1.4 MB of bf16 weights
    # VMEM-resident across grid steps while x/out tiles double-buffer.
    resident = lambda a: pl.BlockSpec(a.shape, lambda i: (0,) * a.ndim)

    flops = 2 * B_pad * (K_IN * HIDDEN + HIDDEN * HIDDEN + HIDDEN * OUT_PAD)
    weight_bytes = sum(int(a.size) * a.dtype.itemsize
                       for a in (w1, b1, w2, b2, w3, b3))
    bytes_accessed = int(x2d.size) * 2 + B_pad * OUT_PAD * 4 + weight_bytes

    out = pl.pallas_call(
        mlp_kernel,
        out_shape=jax.ShapeDtypeStruct((B_pad, OUT_PAD), jnp.float32),
        grid=grid,
        in_specs=[pl.BlockSpec((TB, K_IN), lambda i: (i, 0)),
                  resident(w1), resident(b1),
                  resident(w2), resident(b2),
                  resident(w3), resident(b3)],
        out_specs=pl.BlockSpec((TB, OUT_PAD), lambda i: (i, 0)),
        compiler_params=pltpu.CompilerParams(
            # independent batch tiles -> megacore sharding on v7x (2 TCs)
            dimension_semantics=("parallel",),
            # explicit budget: plenty for the TB=512 buffers even against
            # v5e's 16 MiB scoped default, well within v7x's 64 MiB physical
            vmem_limit_bytes=32 * 1024 * 1024,
        ),
        cost_estimate=pl.CostEstimate(
            flops=flops, transcendentals=0, bytes_accessed=bytes_accessed),
    )(x2d, w1, b1, w2, b2, w3, b3)
    return out[:B, :num_classes]


def init_params(key, num_classes=NUM_CLASSES):
    """Mirror nn.Linear default init (U(+/- 1/sqrt(fan_in))).

    Weights are stored transposed (in, out) so the kernel computes x @ W;
    W3/b3 are zero-padded to a lane-dense 128-wide output tile; weights are
    cast to bf16 once here so there is zero per-call layout cost.
    """
    def linear(k, fan_in, fan_out):
        kw, kb = jax.random.split(k)
        bound = 1.0 / jnp.sqrt(fan_in)
        w = jax.random.uniform(kw, (fan_in, fan_out), jnp.float32, -bound, bound)
        b = jax.random.uniform(kb, (1, fan_out), jnp.float32, -bound, bound)
        return w, b

    k1, k2, k3 = jax.random.split(key, 3)
    w1, b1 = linear(k1, K_IN, HIDDEN)
    w2, b2 = linear(k2, HIDDEN, HIDDEN)
    w3, b3 = linear(k3, HIDDEN, num_classes)

    w3 = jnp.pad(w3, ((0, 0), (0, OUT_PAD - num_classes)))     # zero class cols
    b3 = jnp.pad(b3, ((0, 0), (0, OUT_PAD - num_classes)))
    return (w1.astype(jnp.bfloat16), b1,
            w2.astype(jnp.bfloat16), b2,
            w3.astype(jnp.bfloat16), b3)


def reference_forward(x_nchw, params, num_classes=NUM_CLASSES):
    """Pure-JAX reference with identical bf16-input / f32-accumulate math."""
    w1, b1, w2, b2, w3, b3 = params
    B = x_nchw.shape[0]
    x = x_nchw.reshape(B, K_IN).astype(jnp.bfloat16)
    h = jnp.maximum(jnp.dot(x, w1, preferred_element_type=jnp.float32) + b1, 0.0)
    h = jnp.maximum(jnp.dot(h.astype(jnp.bfloat16), w2,
                            preferred_element_type=jnp.float32) + b2, 0.0)
    logits = jnp.dot(h.astype(jnp.bfloat16), w3,
                     preferred_element_type=jnp.float32) + b3
    return logits[:, :num_classes]


if __name__ == "__main__":
    key = jax.random.PRNGKey(0)
    kx, kp = jax.random.split(key)
    batch = 4
    x = jax.random.normal(kx, (batch, 1, 28, 28), jnp.float32)  # FashionMNIST-shaped
    params = init_params(kp, NUM_CLASSES)

    out = neural_network_forward(x, params, NUM_CLASSES)
    out = jax.block_until_ready(out)

    ref = reference_forward(x, params, NUM_CLASSES)
    assert out.shape == (batch, NUM_CLASSES)
    assert jnp.allclose(out, ref, atol=1e-2, rtol=1e-2), \
        f"max abs err = {float(jnp.max(jnp.abs(out - ref)))}"
    print("KERNEL_OK")
</pallas_src>

<mosaic_0001>
module attributes {stable_mosaic.version = 11 : i64} {
  func.func @mlp_kernel(%arg0: i32, %arg1: memref<16x784xbf16, #tpu.memory_space<vmem>>, %arg2: memref<784x512xbf16, #tpu.memory_space<vmem>>, %arg3: memref<1x512xf32, #tpu.memory_space<vmem>>, %arg4: memref<512x512xbf16, #tpu.memory_space<vmem>>, %arg5: memref<1x512xf32, #tpu.memory_space<vmem>>, %arg6: memref<512x128xbf16, #tpu.memory_space<vmem>>, %arg7: memref<1x128xf32, #tpu.memory_space<vmem>>, %arg8: memref<16x128xf32, #tpu.memory_space<vmem>>) attributes {dimension_semantics = [#tpu.dimension_semantics<parallel>], iteration_bounds = array<i64: 1>, scalar_prefetch = 0 : i64, scratch_operands = 0 : i64, tpu.core_type = #tpu.core_type<tc>, window_params = [{transform_indices = @transform_0, window_bounds = array<i64: 16, 784>}, {pipeline_mode = #tpu.pipeline_mode<synchronous>, transform_indices = @transform_1, window_bounds = array<i64: 784, 512>}, {pipeline_mode = #tpu.pipeline_mode<synchronous>, transform_indices = @transform_2, window_bounds = array<i64: 1, 512>}, {pipeline_mode = #tpu.pipeline_mode<synchronous>, transform_indices = @transform_3, window_bounds = array<i64: 512, 512>}, {pipeline_mode = #tpu.pipeline_mode<synchronous>, transform_indices = @transform_4, window_bounds = array<i64: 1, 512>}, {pipeline_mode = #tpu.pipeline_mode<synchronous>, transform_indices = @transform_5, window_bounds = array<i64: 512, 128>}, {pipeline_mode = #tpu.pipeline_mode<synchronous>, transform_indices = @transform_6, window_bounds = array<i64: 1, 128>}, {transform_indices = @transform_7, window_bounds = array<i64: 16, 128>}]} {
    %c0 = arith.constant 0 : index
    %c0_0 = arith.constant 0 : index
    %0 = vector.load %arg1[%c0, %c0_0] : memref<16x784xbf16, #tpu.memory_space<vmem>>, vector<16x784xbf16>
    %c0_1 = arith.constant 0 : index
    %c0_2 = arith.constant 0 : index
    %1 = vector.load %arg2[%c0_1, %c0_2] : memref<784x512xbf16, #tpu.memory_space<vmem>>, vector<784x512xbf16>
    %cst = arith.constant dense<0.000000e+00> : vector<16x512xf32>
    %2 = tpu.matmul %0, %1, %cst {dimension_numbers = #tpu.dot_dimension_numbers<[1], [0], [0], [1], [0, 0, 1, 1], [], []>} : vector<16x784xbf16>, vector<784x512xbf16>, vector<16x512xf32> -> vector<16x512xf32>
    %c0_3 = arith.constant 0 : index
    %c0_4 = arith.constant 0 : index
    %3 = vector.load %arg3[%c0_3, %c0_4] : memref<1x512xf32, #tpu.memory_space<vmem>>, vector<1x512xf32>
    %4 = vector.broadcast %3 : vector<1x512xf32> to vector<16x512xf32>
    %5 = arith.addf %2, %4 : vector<16x512xf32>
    %cst_5 = arith.constant 0.000000e+00 : f32
    %6 = vector.broadcast %cst_5 : f32 to vector<16x512xf32>
    %7 = arith.maximumf %5, %6 : vector<16x512xf32>
    %8 = arith.truncf %7 : vector<16x512xf32> to vector<16x512xbf16>
    %c0_6 = arith.constant 0 : index
    %c0_7 = arith.constant 0 : index
    %9 = vector.load %arg4[%c0_6, %c0_7] : memref<512x512xbf16, #tpu.memory_space<vmem>>, vector<512x512xbf16>
    %cst_8 = arith.constant dense<0.000000e+00> : vector<16x512xf32>
    %10 = tpu.matmul %8, %9, %cst_8 {dimension_numbers = #tpu.dot_dimension_numbers<[1], [0], [0], [1], [0, 0, 1, 1], [], []>} : vector<16x512xbf16>, vector<512x512xbf16>, vector<16x512xf32> -> vector<16x512xf32>
    %c0_9 = arith.constant 0 : index
    %c0_10 = arith.constant 0 : index
    %11 = vector.load %arg5[%c0_9, %c0_10] : memref<1x512xf32, #tpu.memory_space<vmem>>, vector<1x512xf32>
    %12 = vector.broadcast %11 : vector<1x512xf32> to vector<16x512xf32>
    %13 = arith.addf %10, %12 : vector<16x512xf32>
    %cst_11 = arith.constant 0.000000e+00 : f32
    %14 = vector.broadcast %cst_11 : f32 to vector<16x512xf32>
    %15 = arith.maximumf %13, %14 : vector<16x512xf32>
    %16 = arith.truncf %15 : vector<16x512xf32> to vector<16x512xbf16>
    %c0_12 = arith.constant 0 : index
    %c0_13 = arith.constant 0 : index
    %17 = vector.load %arg6[%c0_12, %c0_13] : memref<512x128xbf16, #tpu.memory_space<vmem>>, vector<512x128xbf16>
    %cst_14 = arith.constant dense<0.000000e+00> : vector<16x128xf32>
    %18 = tpu.matmul %16, %17, %cst_14 {dimension_numbers = #tpu.dot_dimension_numbers<[1], [0], [0], [1], [0, 0, 1, 1], [], []>} : vector<16x512xbf16>, vector<512x128xbf16>, vector<16x128xf32> -> vector<16x128xf32>
    %c0_15 = arith.constant 0 : index
    %c0_16 = arith.constant 0 : index
    %19 = vector.load %arg7[%c0_15, %c0_16] : memref<1x128xf32, #tpu.memory_space<vmem>>, vector<1x128xf32>
    %20 = vector.broadcast %19 : vector<1x128xf32> to vector<16x128xf32>
    %21 = arith.addf %18, %20 : vector<16x128xf32>
    %c0_17 = arith.constant 0 : index
    %c0_18 = arith.constant 0 : index
    %22 = vector.load %arg8[%c0_17, %c0_18] : memref<16x128xf32, #tpu.memory_space<vmem>>, vector<16x128xf32>
    tpu.vector_store %arg8[%c0_17, %c0_18], %21 {strides = array<i32>} : memref<16x128xf32, #tpu.memory_space<vmem>>, vector<16x128xf32>,
    return
  }
  func.func @transform_0(%arg0: i32) -> (i32, i32) {
    %c0_i32 = arith.constant 0 : i32
    %c0_i32_0 = arith.constant 0 : i32
    return %arg0, %c0_i32 : i32, i32
  }
  func.func @transform_1(%arg0: i32) -> (i32, i32) {
    %c0_i32 = arith.constant 0 : i32
    %c0_i32_0 = arith.constant 0 : i32
    %c0_i32_1 = arith.constant 0 : i32
    return %c0_i32, %c0_i32_0 : i32, i32
  }
  func.func @transform_2(%arg0: i32) -> (i32, i32) {
    %c0_i32 = arith.constant 0 : i32
    %c0_i32_0 = arith.constant 0 : i32
    %c0_i32_1 = arith.constant 0 : i32
    return %c0_i32, %c0_i32_0 : i32, i32
  }
  func.func @transform_3(%arg0: i32) -> (i32, i32) {
    %c0_i32 = arith.constant 0 : i32
    %c0_i32_0 = arith.constant 0 : i32
    %c0_i32_1 = arith.constant 0 : i32
    return %c0_i32, %c0_i32_0 : i32, i32
  }
  func.func @transform_4(%arg0: i32) -> (i32, i32) {
    %c0_i32 = arith.constant 0 : i32
    %c0_i32_0 = arith.constant 0 : i32
    %c0_i32_1 = arith.constant 0 : i32
    return %c0_i32, %c0_i32_0 : i32, i32
  }
  func.func @transform_5(%arg0: i32) -> (i32, i32) {
    %c0_i32 = arith.constant 0 : i32
    %c0_i32_0 = arith.constant 0 : i32
    %c0_i32_1 = arith.constant 0 : i32
    return %c0_i32, %c0_i32_0 : i32, i32
  }
  func.func @transform_6(%arg0: i32) -> (i32, i32) {
    %c0_i32 = arith.constant 0 : i32
    %c0_i32_0 = arith.constant 0 : i32
    %c0_i32_1 = arith.constant 0 : i32
    return %c0_i32, %c0_i32_0 : i32, i32
  }
  func.func @transform_7(%arg0: i32) -> (i32, i32) {
    %c0_i32 = arith.constant 0 : i32
    %c0_i32_0 = arith.constant 0 : i32
    return %arg0, %c0_i32 : i32, i32
  }
}

</mosaic_0001>

<bundles_post_ra>
// kernel: tpu_custom_call.1
= control target key start
LH: loop header
LB: loop body
LE: loop exit
PB: predicated region body
PF: predicated region fallthrough
CT: control target
= control target key end

     0   :  { %12 = vsyncpa [#allocation3], 0  ;;  %s4257_s0 = inlined_call_operand.hbm [shape: bf16[16,784], index: 0, kind: input, shape index: {}]   ;;  %s4258_s1 = inlined_call_operand.hbm [shape: bf16[784,512], index: 1, kind: input, shape index: {}]   ;;  %s4259_s2 = inlined_call_operand.hbm [shape: f32[1,512], index: 2, kind: input, shape index: {}]   ;;  %s4260_s3 = inlined_call_operand.hbm [shape: bf16[512,512], index: 3, kind: input, shape index: {}]   ;;  %s4261_s4 = inlined_call_operand.vmem [shape: f32[1,512], index: 4, kind: input, shape index: {}]   ;;  %s4262_s5 = inlined_call_operand.hbm [shape: bf16[512,128], index: 5, kind: input, shape index: {}]   ;;  %s4263_s6 = inlined_call_operand.vmem [shape: f32[1,128], index: 6, kind: input, shape index: {}]   ;;  %s4264_s7 = inlined_call_operand.hbm [shape: f32[16,128], index: 7, kind: output, shape index: {}]  }
   0x1   :  { %13 = vsyncpa [#allocation6], 0 }
   0x2   :  { %14 = vsyncpa [#allocation9], 0 }
   0x3   :  { %15 = vsyncpa [#allocation4], 0  ;;  %s4118_s24 = smov [#allocation5]  }
   0x4   :  { %s33_s25 = sshll.u32 %s4118_s24, 4  ;;  %s34_s25 = int_to_ptr.vmem [resolvable:$true] %s33_s25 }
   0x5   :  { %s3998_s26 = scalar_lea.vmem %s34_s25, 25088  ;;  %p4003_p1 = scmp.lt.s32.totalorder %s34_s25, %s34_s25 }
   0x6   :  { %p3999_p0 = scmp.ne.s32.totalorder %s34_s25, %s3998_s26  ;;  %p4004_p2 = scmp.lt.s32.totalorder %s3998_s26, %s3998_s26 }
   0x8   :  { %p4005_p3 = por %p4004_p2, %p4003_p1 }
   0xa   :  { %p4006_p4 = pnand %p4005_p3, %p3999_p0 }
   0xc   :  { %4009 = shalt.err (!%p4006_p4)
}
   0xd   :  { %s4119_s27 = smov 256   ;;  %s4120_s28 = smov 16  }
   0xe   :  { %39 = dma.hbm_to_vmem [thread:$0]  %s4258_s1, 25088, %s34_s25, [#allocation6], %s4119_s27, %s4119_s27, %s4120_s28  }
   0xf   :  { %s4121_s8 = smov [#allocation8]   ;;  %s4122_s10 = smov [#allocation2]  }
  0x10   :  { %s55_s9 = sshll.u32 %s4121_s8, 4  ;;  %s21_s11 = sshll.u32 %s4122_s10, 4  ;;  %s56_s9 = int_to_ptr.vmem [resolvable:$true] %s55_s9  ;;  %s22_s11 = int_to_ptr.vmem [resolvable:$true] %s21_s11 }
  0x11   :  { %s4018_s12 = scalar_lea.vmem %s56_s9, 16384  ;;  %p4023_p6 = scmp.lt.s32.totalorder %s56_s9, %s56_s9 }
  0x12   :  { %p4019_p5 = scmp.ne.s32.totalorder %s56_s9, %s4018_s12  ;;  %p4024_p7 = scmp.lt.s32.totalorder %s4018_s12, %s4018_s12 }
  0x14   :  { %p4025_p8 = por %p4024_p7, %p4023_p6 }
  0x16   :  { %p4026_p9 = pnand %p4025_p8, %p4019_p5 }
  0x18   :  { %4029 = shalt.err (!%p4026_p9)
}
  0x19   :  { %61 = dma.hbm_to_vmem [thread:$0]  %s4260_s3, 16384, %s56_s9, [#allocation9], %s4119_s27, %s4119_s27, %s4120_s28  }
  0x1a   :  { %s4038_s15 = scalar_lea.vmem %s22_s11, 896  ;;  %p4043_p11 = scmp.lt.s32.totalorder %s22_s11, %s22_s11 }
  0x1b   :  { %p4039_p10 = scmp.ne.s32.totalorder %s22_s11, %s4038_s15  ;;  %p4044_p12 = scmp.lt.s32.totalorder %s4038_s15, %s4038_s15 }
  0x1d   :  { %p4045_p13 = por %p4044_p12, %p4043_p11 }
  0x1f   :  { %p4046_p0 = pnand %p4045_p13, %p4039_p10 }
  0x21   :  { %4049 = shalt.err (!%p4046_p0)
}
  0x22   :  { %s4123_s1 = smov 448   ;;  %s4124_s16 = smov 28  }
  0x23   :  { %27 = dma.hbm_to_vmem [thread:$0]  %s4257_s0, 896, %s22_s11, [#allocation3], %s4123_s1, %s4123_s1, %s4124_s16  }
  0x24   :  { %s4125_s19 = smov [#allocation7]   ;;  %s4126_s21 = smov [#allocation10]  }
  0x25   :  { %s46_s20 = sshll.u32 %s4125_s19, 4  ;;  %s69_s22 = sshll.u32 %s4126_s21, 4  ;;  %s47_s20 = int_to_ptr.vmem [resolvable:$true] %s46_s20  ;;  %s70_s22 = int_to_ptr.vmem [resolvable:$true] %s69_s22 }
  0x26   :  { %s4058_s3 = scalar_lea.vmem %s47_s20, 64  ;;  %p4063_p2 = scmp.lt.s32.totalorder %s47_s20, %s47_s20 }
  0x27   :  { %p4059_p1 = scmp.ne.s32.totalorder %s47_s20, %s4058_s3  ;;  %p4064_p3 = scmp.lt.s32.totalorder %s4058_s3, %s4058_s3 }
  0x29   :  { %p4065_p4 = por %p4064_p3, %p4063_p2 }
  0x2b   :  { %p4066_p5 = pnand %p4065_p4, %p4059_p1 }
  0x2d   :  { %4069 = shalt.err (!%p4066_p5)
}
  0x2e   :  { %49 = dma.hbm_to_vmem [thread:$0]  %s4259_s2, 64, %s47_s20, [#allocation6]  }
  0x2f   :  { %s4078_s25 = scalar_lea.vmem %s70_s22, 4096  ;;  %p4083_p7 = scmp.lt.s32.totalorder %s70_s22, %s70_s22 }
  0x30   :  { %p4079_p6 = scmp.ne.s32.totalorder %s70_s22, %s4078_s25  ;;  %p4084_p8 = scmp.lt.s32.totalorder %s4078_s25, %s4078_s25 }
  0x32   :  { %p4085_p9 = por %p4084_p8, %p4083_p7 }
  0x34   :  { %p4086_p10 = pnand %p4085_p9, %p4079_p6 }
  0x36   :  { %4089 = shalt.err (!%p4086_p10)
}
  0x37   :  { %s4127_s0 = smov 64   ;;  %s4128_s26 = smov 4  }
  0x38   :  { %75 = dma.hbm_to_vmem [thread:$0]  %s4262_s5, 4096, %s70_s22, [#allocation9], %s4127_s0, %s4127_s0, %s4128_s26  }
  0x39   :  { %4110 = dma.done.wait [#allocation3], 896  }
  0x3a   :  { %4111 = vsyncadd [#allocation3], 4294966400 }
  0x3b   :  { %4112 = dma.done.wait [#allocation6], 25152  }
  0x3c   :  { %4113 = vsyncadd [#allocation6], 4294942144 }
  0x3d   :  { %4114 = dma.done.wait [#allocation9], 20480  }
  0x3e   :  { %4115 = vsyncadd [#allocation9], 4294946816  ;;  %v3460_v0 = vld [vmem:[#allocation5 + $0xe4] ss:$16 sps:$4 sm:$0xff]   ;;  %v3464_v2 = vld [vmem:[#allocation5 + $0xe0] ss:$16 sps:$4 sm:$0xff]  }
  0x3f   :  { %v3462_v1 = vld [vmem:[#allocation5 + $0x2e4] ss:$16 sps:$4 sm:$0xff]   ;;  %1339 = vmatprep.subr.bf16.mxu0 %v3460_v0  ;;  %v3465_v3 = vld [vmem:[#allocation5 + $0x2e0] ss:$16 sps:$4 sm:$0xff]   ;;  %v4188_v49 = vld [vmem:[#allocation2 + $0x4] ss:$28 sps:$4 sm:$0xff]  }
  0x40   :  { %1382 = vmatprep.subr.bf16.mxu1 %v3462_v1  ;;  %v3466_v4 = vld [vmem:[#allocation5 + $0xc4] ss:$16 sps:$4 sm:$0xff]   ;;  %1340 = vmatpush1.bf16.msra.mxu0 %v3464_v2  ;;  %v3470_v6 = vld [vmem:[#allocation5 + $0xc0] ss:$16 sps:$4 sm:$0xff]   ;;  %vm1335_vm0 = vcmask 130048   ;;  %s4130_s30 = smov [#allocation11]  }
  0x41   :  { %1383 = vmatpush1.bf16.msra.mxu1 %v3465_v3  ;;  %v3468_v5 = vld [vmem:[#allocation5 + $0x2c4] ss:$16 sps:$4 sm:$0xff]   ;;  %1341 = vmatprep.subr.bf16.mxu0 %v3466_v4  ;;  %v3471_v7 = vld [vmem:[#allocation5 + $0x2c0] ss:$16 sps:$4 sm:$0xff]   ;;  %s3021_s8 = sshll.u32 %s4130_s30, 4  ;;  %s3022_s8 = int_to_ptr.vmem [resolvable:$true] %s3021_s8 }
  0x42   :  { %1384 = vmatprep.subr.bf16.mxu1 %v3468_v5  ;;  %v3472_v8 = vld [vmem:[#allocation5 + $0xa4] ss:$16 sps:$4 sm:$0xff]   ;;  %v3476_v10 = vld [vmem:[#allocation5 + $0xa0] ss:$16 sps:$4 sm:$0xff]   ;;  %1371 = vmatprep.mubr.bf16.mxu0 %v4188_v49  ;;  %s4090_s9 = scalar_lea.vmem %s3022_s8, 256  ;;  %p4095_p12 = scmp.lt.s32.totalorder %s3022_s8, %s3022_s8 }
  0x43   :  { %v3474_v9 = vld [vmem:[#allocation5 + $0x2a4] ss:$16 sps:$4 sm:$0xff]   ;;  %v3477_v11 = vld [vmem:[#allocation5 + $0x2a0] ss:$16 sps:$4 sm:$0xff]   ;;  %p4091_p11 = scmp.ne.s32.totalorder %s3022_s8, %s4090_s9  ;;  %p4096_p13 = scmp.lt.s32.totalorder %s4090_s9, %s4090_s9 }
  0x44   :  { %1342 = vmatpush1.bf16.msra.mxu0 %v3470_v6  ;;  %v3478_v12 = vld [vmem:[#allocation5 + $0x84] ss:$16 sps:$4 sm:$0xff]   ;;  %v3482_v14 = vld [vmem:[#allocation5 + $0x80] ss:$16 sps:$4 sm:$0xff]  }
  0x45   :  { %1385 = vmatpush1.bf16.msra.mxu1 %v3471_v7  ;;  %1343 = vmatprep.subr.bf16.mxu0 %v3472_v8  ;;  %v3480_v13 = vld [vmem:[#allocation5 + $0x284] ss:$16 sps:$4 sm:$0xff]   ;;  %v3483_v15 = vld [vmem:[#allocation5 + $0x280] ss:$16 sps:$4 sm:$0xff]   ;;  %p4097_p0 = por %p4096_p13, %p4095_p12 }
  0x46   :  { %1386 = vmatprep.subr.bf16.mxu1 %v3474_v9  ;;  %v3484_v16 = vld [vmem:[#allocation5 + $0x64] ss:$16 sps:$4 sm:$0xff]   ;;  %v3488_v18 = vld [vmem:[#allocation5 + $0x60] ss:$16 sps:$4 sm:$0xff]   ;;  %v3573_v9 = vld [vmem:[#allocation5 + $0xec] ss:$16 sps:$4 sm:$0xff]  }
  0x47   :  { %v3486_v17 = vld [vmem:[#allocation5 + $0x264] ss:$16 sps:$4 sm:$0xff]   ;;  %v3489_v19 = vld [vmem:[#allocation5 + $0x260] ss:$16 sps:$4 sm:$0xff]   ;;  %p4098_p1 = pnand %p4097_p0, %p4091_p11 }
  0x48   :  { %1344 = vmatpush1.bf16.msra.mxu0 %v3476_v10  ;;  %v3490_v20 = vld [vmem:[#allocation5 + $0x44] ss:$16 sps:$4 sm:$0xff]   ;;  %v3494_v22 = vld [vmem:[#allocation5 + $0x40] ss:$16 sps:$4 sm:$0xff]  }
  0x49   :  { %1387 = vmatpush1.bf16.msra.mxu1 %v3477_v11  ;;  %1345 = vmatprep.subr.bf16.mxu0 %v3478_v12  ;;  %v3492_v21 = vld [vmem:[#allocation5 + $0x244] ss:$16 sps:$4 sm:$0xff]   ;;  %v3495_v23 = vld [vmem:[#allocation5 + $0x240] ss:$16 sps:$4 sm:$0xff]   ;;  %v4129_v11 = vmov 0  }
  0x4a   :  { %1388 = vmatprep.subr.bf16.mxu1 %v3480_v13  ;;  %v3496_v24 = vld [vmem:[#allocation5 + $0x24] ss:$16 sps:$4 sm:$0xff]   ;;  %v3500_v26 = vld [vmem:[#allocation5 + $0x20] ss:$16 sps:$4 sm:$0xff]   ;;  %v3571_v13 = vld [vmem:[#allocation5 + $0xe8] ss:$16 sps:$4 sm:$0xff]  }
  0x4b   :  { %v3498_v25 = vld [vmem:[#allocation5 + $0x224] ss:$16 sps:$4 sm:$0xff]   ;;  %v3501_v27 = vld [vmem:[#allocation5 + $0x220] ss:$16 sps:$4 sm:$0xff]  }
  0x4c   :  { %1346 = vmatpush1.bf16.msra.mxu0 %v3482_v14  ;;  %v3502_v28 = vld [vmem:[#allocation5 + $0x4] ss:$16 sps:$4 sm:$0xff]   ;;  %v3506_v30 = vld [vmem:[#allocation5] ss:$16 sps:$4 sm:$0xff]  }
  0x4d   :  { %1389 = vmatpush1.bf16.msra.mxu1 %v3483_v15  ;;  %1347 = vmatprep.subr.bf16.mxu0 %v3484_v16  ;;  %v3504_v29 = vld [vmem:[#allocation5 + $0x204] ss:$16 sps:$4 sm:$0xff]   ;;  %v3507_v31 = vld [vmem:[#allocation5 + $0x200] ss:$16 sps:$4 sm:$0xff]   ;;  %v3580_v16 = vld [vmem:[#allocation5 + $0xcc] ss:$16 sps:$4 sm:$0xff]  }
  0x4e   :  { %1390 = vmatprep.subr.bf16.mxu1 %v3486_v17  ;;  %v3508_v32 = vld [vmem:[#allocation5 + $0x1e4] ss:$16 sps:$4 sm:$0xff]   ;;  %v3512_v34 = vld [vmem:[#allocation5 + $0x1e0] ss:$16 sps:$4 sm:$0xff]  }
  0x4f   :  { %v3510_v33 = vld [vmem:[#allocation5 + $0x3e4] ss:$16 sps:$4 sm:$0xff]   ;;  %v3513_v35 = vld [vmem:[#allocation5 + $0x3e0] ss:$16 sps:$4 sm:$0xff]  }
  0x50   :  { %1348 = vmatpush1.bf16.msra.mxu0 %v3488_v18  ;;  %v3514_v36 = vld [vmem:[#allocation5 + $0x1c4] ss:$16 sps:$4 sm:$0xff]   ;;  %v3518_v38 = vld [vmem:[#allocation5 + $0x1c0] ss:$16 sps:$4 sm:$0xff]   ;;  %v3578_v18 = vld [vmem:[#allocation5 + $0xc8] ss:$16 sps:$4 sm:$0xff]  }
  0x51   :  { %1391 = vmatpush1.bf16.msra.mxu1 %v3489_v19  ;;  %1349 = vmatprep.subr.bf16.mxu0 %v3490_v20  ;;  %v3516_v37 = vld [vmem:[#allocation5 + $0x3c4] ss:$16 sps:$4 sm:$0xff]   ;;  %v3519_v39 = vld [vmem:[#allocation5 + $0x3c0] ss:$16 sps:$4 sm:$0xff]   ;;  %v3586_v20 = vld [vmem:[#allocation5 + $0xac] ss:$16 sps:$4 sm:$0xff]  }
  0x52   :  { %1392 = vmatprep.subr.bf16.mxu1 %v3492_v21  ;;  %v3520_v40 = vld [vmem:[#allocation5 + $0x1a4] ss:$16 sps:$4 sm:$0xff]   ;;  %v3524_v42 = vld [vmem:[#allocation5 + $0x1a0] ss:$16 sps:$4 sm:$0xff]  }
  0x53   :  { %v3522_v41 = vld [vmem:[#allocation5 + $0x3a4] ss:$16 sps:$4 sm:$0xff]   ;;  %v3525_v43 = vld [vmem:[#allocation5 + $0x3a0] ss:$16 sps:$4 sm:$0xff]  }
  0x54   :  { %1350 = vmatpush1.bf16.msra.mxu0 %v3494_v22  ;;  %v3526_v44 = vld [vmem:[#allocation5 + $0x184] ss:$16 sps:$4 sm:$0xff]   ;;  %v3530_v46 = vld [vmem:[#allocation5 + $0x180] ss:$16 sps:$4 sm:$0xff]   ;;  %v3584_v22 = vld [vmem:[#allocation5 + $0xa8] ss:$16 sps:$4 sm:$0xff]  }
  0x55   :  { %1393 = vmatpush1.bf16.msra.mxu1 %v3495_v23  ;;  %1351 = vmatprep.subr.bf16.mxu0 %v3496_v24  ;;  %v3528_v45 = vld [vmem:[#allocation5 + $0x384] ss:$16 sps:$4 sm:$0xff]   ;;  %v3531_v47 = vld [vmem:[#allocation5 + $0x380] ss:$16 sps:$4 sm:$0xff]   ;;  %v3592_v24 = vld [vmem:[#allocation5 + $0x8c] ss:$16 sps:$4 sm:$0xff]  }
  0x56   :  { %1394 = vmatprep.subr.bf16.mxu1 %v3498_v25  ;;  %v3532_v48 = vld [vmem:[#allocation5 + $0x164] ss:$16 sps:$4 sm:$0xff]   ;;  %v3536_v52 = vld [vmem:[#allocation5 + $0x160] ss:$16 sps:$4 sm:$0xff]  }
  0x57   :  { %v3534_v50 = vld [vmem:[#allocation5 + $0x364] ss:$16 sps:$4 sm:$0xff]   ;;  %v3537_v53 = vld [vmem:[#allocation5 + $0x360] ss:$16 sps:$4 sm:$0xff]  }
  0x58   :  { %1352 = vmatpush1.bf16.msra.mxu0 %v3500_v26  ;;  %v4190_v51 = vld [vmem:[#allocation2 + $0xc] ss:$28 sps:$4 sm:$0xff]   ;;  %v4194_v4 = vld [vmem:[#allocation2] ss:$28 sps:$4 sm:$0xff]   ;;  %v3577_v14 = vld [vmem:[#allocation2 + $0x18] ss:$28 sps:$4 sm:$0xff]  }
  0x59   :  { %1395 = vmatpush1.bf16.msra.mxu1 %v3501_v27  ;;  %1353 = vmatprep.subr.bf16.mxu0 %v3502_v28  ;;  %v3538_v54 = vld [vmem:[#allocation5 + $0x144] ss:$16 sps:$4 sm:$0xff]   ;;  %v3542_v56 = vld [vmem:[#allocation5 + $0x140] ss:$16 sps:$4 sm:$0xff]   ;;  %v3590_v26 = vld [vmem:[#allocation5 + $0x88] ss:$16 sps:$4 sm:$0xff]  }
  0x5a   :  { %1396 = vmatprep.subr.bf16.mxu1 %v3504_v29  ;;  %1414 = vmatprep.mubr.bf16.mxu1 %v4190_v51  ;;  %v3540_v55 = vld [vmem:[#allocation5 + $0x344] ss:$16 sps:$4 sm:$0xff]   ;;  %v3543_v57 = vld [vmem:[#allocation5 + $0x340] ss:$16 sps:$4 sm:$0xff]   ;;  %v3598_v28 = vld [vmem:[#allocation5 + $0x6c] ss:$16 sps:$4 sm:$0xff]  }
  0x5b   :  { %v3544_v58 = vld [vmem:[#allocation5 + $0x124] ss:$16 sps:$4 sm:$0xff]   ;;  %v3548_v60 = vld [vmem:[#allocation5 + $0x120] ss:$16 sps:$4 sm:$0xff]  }
  0x5c   :  { %1354 = vmatpush1.bf16.msra.mxu0 %v3506_v30  ;;  %v3546_v59 = vld [vmem:[#allocation5 + $0x324] ss:$16 sps:$4 sm:$0xff]   ;;  %v3549_v61 = vld [vmem:[#allocation5 + $0x320] ss:$16 sps:$4 sm:$0xff]   ;;  %v3596_v30 = vld [vmem:[#allocation5 + $0x68] ss:$16 sps:$4 sm:$0xff]  }
  0x5d   :  { %1397 = vmatpush1.bf16.msra.mxu1 %v3507_v31  ;;  %1355 = vmatprep.subr.bf16.mxu0 %v3508_v32  ;;  %v3550_v62 = vld [vmem:[#allocation5 + $0x104] ss:$16 sps:$4 sm:$0xff]   ;;  %v3554_v0 = vld [vmem:[#allocation5 + $0x100] ss:$16 sps:$4 sm:$0xff]   ;;  %v3604_v32 = vld [vmem:[#allocation5 + $0x4c] ss:$16 sps:$4 sm:$0xff]  }
  0x5e   :  { %1398 = vmatprep.subr.bf16.mxu1 %v3510_v33  ;;  %v3552_v63 = vld [vmem:[#allocation5 + $0x304] ss:$16 sps:$4 sm:$0xff]   ;;  %v3555_v1 = vld [vmem:[#allocation5 + $0x300] ss:$16 sps:$4 sm:$0xff]   ;;  %v4200_v33 = vld [vmem:[#allocation2 + $0x14] ss:$28 sps:$4 sm:$0xff]  }
  0x5f   :  { %v3564_v2 = vld [vmem:[#allocation5 + $0x4e4] ss:$16 sps:$4 sm:$0xff]   ;;  %v3559_v5 = vld [vmem:[#allocation2 + $0x8] ss:$28 sps:$4 sm:$0xff]  }
  0x60   :  { %1356 = vmatpush2.bf16.msra.mxu0 %v3512_v34  ;;  %v3567_v3 = vld [vmem:[#allocation5 + $0x604] ss:$16 sps:$4 sm:$0xff]   ;;  %v3562_v6 = vld [vmem:[#allocation5 + $0x4e0] ss:$16 sps:$4 sm:$0xff]  }
  0x61   :  { %1399 = vmatpush2.bf16.msra.mxu1 %v3513_v35  ;;  %1357 = vmatprep.subr.bf16.mxu0 %v3514_v36  ;;  %v3565_v7 = vld [vmem:[#allocation5 + $0x600] ss:$16 sps:$4 sm:$0xff]   ;;  %v3570_v8 = vld [vmem:[#allocation5 + $0x4c4] ss:$16 sps:$4 sm:$0xff]   ;;  %v3602_v35 = vld [vmem:[#allocation5 + $0x48] ss:$16 sps:$4 sm:$0xff]  }
  0x62   :  { %1400 = vmatprep.subr.bf16.mxu1 %v3516_v37  ;;  %v3568_v10 = vld [vmem:[#allocation5 + $0x4c0] ss:$16 sps:$4 sm:$0xff]   ;;  %v3576_v12 = vld [vmem:[#allocation5 + $0x4a4] ss:$16 sps:$4 sm:$0xff]   ;;  %v3610_v37 = vld [vmem:[#allocation5 + $0x2c] ss:$16 sps:$4 sm:$0xff]  }
  0x63   :  { %v3574_v15 = vld [vmem:[#allocation5 + $0x4a0] ss:$16 sps:$4 sm:$0xff]   ;;  %v3583_v17 = vld [vmem:[#allocation5 + $0x484] ss:$16 sps:$4 sm:$0xff]  }
  0x64   :  { %1358 = vmatpush2.bf16.msra.mxu0 %v3518_v38  ;;  %v3581_v19 = vld [vmem:[#allocation5 + $0x480] ss:$16 sps:$4 sm:$0xff]   ;;  %v3589_v21 = vld [vmem:[#allocation5 + $0x464] ss:$16 sps:$4 sm:$0xff]  }
  0x65   :  { %1401 = vmatpush2.bf16.msra.mxu1 %v3519_v39  ;;  %1359 = vmatprep.subr.bf16.mxu0 %v3520_v40  ;;  %v3587_v23 = vld [vmem:[#allocation5 + $0x460] ss:$16 sps:$4 sm:$0xff]   ;;  %v3595_v25 = vld [vmem:[#allocation5 + $0x444] ss:$16 sps:$4 sm:$0xff]   ;;  %v3608_v39 = vld [vmem:[#allocation5 + $0x28] ss:$16 sps:$4 sm:$0xff]  }
  0x66   :  { %1402 = vmatprep.subr.bf16.mxu1 %v3522_v41  ;;  %v3593_v27 = vld [vmem:[#allocation5 + $0x440] ss:$16 sps:$4 sm:$0xff]   ;;  %v3601_v29 = vld [vmem:[#allocation5 + $0x424] ss:$16 sps:$4 sm:$0xff]   ;;  %v3616_v41 = vld [vmem:[#allocation5 + $0xc] ss:$16 sps:$4 sm:$0xff]  }
  0x67   :  { %v3599_v31 = vld [vmem:[#allocation5 + $0x420] ss:$16 sps:$4 sm:$0xff]   ;;  %v3607_v34 = vld [vmem:[#allocation5 + $0x404] ss:$16 sps:$4 sm:$0xff]  }
  0x68   :  { %1360 = vmatpush2.bf16.msra.mxu0 %v3524_v42  ;;  %v3605_v36 = vld [vmem:[#allocation5 + $0x400] ss:$16 sps:$4 sm:$0xff]   ;;  %v3613_v38 = vld [vmem:[#allocation5 + $0x5e4] ss:$16 sps:$4 sm:$0xff]  }
  0x69   :  { %1403 = vmatpush2.bf16.msra.mxu1 %v3525_v43  ;;  %1361 = vmatprep.subr.bf16.mxu0 %v3526_v44  ;;  %v3611_v40 = vld [vmem:[#allocation5 + $0x5e0] ss:$16 sps:$4 sm:$0xff]   ;;  %v3619_v42 = vld [vmem:[#allocation5 + $0x5c4] ss:$16 sps:$4 sm:$0xff]   ;;  %v3614_v43 = vld [vmem:[#allocation5 + $0x8] ss:$16 sps:$4 sm:$0xff]  }
  0x6a   :  { %1404 = vmatprep.subr.bf16.mxu1 %v3528_v45  ;;  %v3617_v44 = vld [vmem:[#allocation5 + $0x5c0] ss:$16 sps:$4 sm:$0xff]   ;;  %v3622_v45 = vld [vmem:[#allocation5 + $0x1ec] ss:$16 sps:$4 sm:$0xff]  }
  0x6c   :  { %1362 = vmatpush2.bf16.msra.mxu0 %v3530_v46  ;;  %v3625_v46 = vld [vmem:[#allocation5 + $0x5a4] ss:$16 sps:$4 sm:$0xff]  }
  0x6d   :  { %1405 = vmatpush2.bf16.msra.mxu1 %v3531_v47  ;;  %1363 = vmatprep.subr.bf16.mxu0 %v3532_v48  ;;  %v3620_v47 = vld [vmem:[#allocation5 + $0x1e8] ss:$16 sps:$4 sm:$0xff]   ;;  %v3623_v48 = vld [vmem:[#allocation5 + $0x5a0] ss:$16 sps:$4 sm:$0xff]  }
  0x6e   :  { %1406 = vmatprep.subr.bf16.mxu1 %v3534_v50  ;;  %v3631_v50 = vld [vmem:[#allocation5 + $0x584] ss:$16 sps:$4 sm:$0xff]  }
  0x70   :  { %1364 = vmatpush2.bf16.msra.mxu0 %v3536_v52  ;;  %v3626_v52 = vld [vmem:[#allocation5 + $0x1c8] ss:$16 sps:$4 sm:$0xff]  }
  0x71   :  { %1407 = vmatpush2.bf16.msra.mxu1 %v3537_v53  ;;  %1365 = vmatprep.subr.bf16.mxu0 %v3538_v54  ;;  %v3629_v53 = vld [vmem:[#allocation5 + $0x580] ss:$16 sps:$4 sm:$0xff]   ;;  %v3634_v54 = vld [vmem:[#allocation5 + $0x1ac] ss:$16 sps:$4 sm:$0xff]  }
  0x72   :  { %1408 = vmatprep.subr.bf16.mxu1 %v3540_v55  ;;  %v3637_v55 = vld [vmem:[#allocation5 + $0x564] ss:$16 sps:$4 sm:$0xff]  }
  0x74   :  { %1366 = vmatpush2.bf16.msra.mxu0 %v3542_v56  ;;  %v3632_v56 = vld [vmem:[#allocation5 + $0x1a8] ss:$16 sps:$4 sm:$0xff]  }
  0x75   :  { %1409 = vmatpush2.bf16.msra.mxu1 %v3543_v57  ;;  %1367 = vmatprep.subr.bf16.mxu0 %v3544_v58  ;;  %v3635_v57 = vld [vmem:[#allocation5 + $0x560] ss:$16 sps:$4 sm:$0xff]   ;;  %v3640_v58 = vld [vmem:[#allocation5 + $0x18c] ss:$16 sps:$4 sm:$0xff]  }
  0x76   :  { %1410 = vmatprep.subr.bf16.mxu1 %v3546_v59  ;;  %v3643_v59 = vld [vmem:[#allocation5 + $0x544] ss:$16 sps:$4 sm:$0xff]  }
  0x78   :  { %1368 = vmatpush2.bf16.msra.mxu0 %v3548_v60  ;;  %v3638_v60 = vld [vmem:[#allocation5 + $0x188] ss:$16 sps:$4 sm:$0xff]  }
  0x79   :  { %1411 = vmatpush2.bf16.msra.mxu1 %v3549_v61  ;;  %1369 = vmatprep.subr.bf16.mxu0 %v3550_v62  ;;  %v3641_v61 = vld [vmem:[#allocation5 + $0x540] ss:$16 sps:$4 sm:$0xff]   ;;  %v3646_v62 = vld [vmem:[#allocation5 + $0x16c] ss:$16 sps:$4 sm:$0xff]  }
  0x7a   :  { %1412 = vmatprep.subr.bf16.mxu1 %v3552_v63  ;;  %v3649_v63 = vld [vmem:[#allocation5 + $0x524] ss:$16 sps:$4 sm:$0xff]  }
  0x7c   :  { %1370 = vmatpush2.bf16.msra.mxu0 %v3554_v0  ;;  %v3644_v0 = vld [vmem:[#allocation5 + $0x168] ss:$16 sps:$4 sm:$0xff]  }
  0x7d   :  { %1413 = vmatpush2.bf16.msra.mxu1 %v3555_v1  ;;  %1425 = vmatprep.subr.bf16.mxu0 %v3564_v2  ;;  %v3647_v1 = vld [vmem:[#allocation5 + $0x520] ss:$16 sps:$4 sm:$0xff]   ;;  %v3652_v2 = vld [vmem:[#allocation5 + $0x14c] ss:$16 sps:$4 sm:$0xff]  }
  0x7e   :  { %1482 = vmatprep.subr.bf16.mxu1 %v3567_v3  ;;  %v3655_v3 = vld [vmem:[#allocation5 + $0x504] ss:$16 sps:$4 sm:$0xff]  }
  0x7f   :  { %1372 = vmatmul.mubr.bf16.vlgmr.msra.gmra.mxu0 %v4194_v4 }
  0x80   :  { %1415 = vmatmul.mubr.bf16.vlgmr.msra.gmra.mxu1 %v3559_v5  ;;  %1426 = vmatpush1.bf16.msra.mxu0 %v3562_v6  ;;  %v3650_v5 = vld [vmem:[#allocation5 + $0x148] ss:$16 sps:$4 sm:$0xff]   ;;  %v3653_v6 = vld [vmem:[#allocation5 + $0x500] ss:$16 sps:$4 sm:$0xff]  }
  0x81   :  { %1483 = vmatpush1.bf16.msra.mxu1 %v3565_v7  ;;  %1427 = vmatprep.subr.bf16.mxu0 %v3570_v8  ;;  %v3661_v7 = vld [vmem:[#allocation5 + $0x12c] ss:$16 sps:$4 sm:$0xff]  }
  0x82   :  { %1500 = vmatprep.mubr.bf16.mxu1 %v4129_v11  ;;  %1511 = vmatprep.subr.bf16.mxu1 %v3573_v9  ;;  %v3664_v8 = vld [vmem:[#allocation5 + $0x2ec] ss:$16 sps:$4 sm:$0xff]   ;;  %v4203_v9 = vld [vmem:[#allocation2 + $0x10] ss:$28 sps:$4 sm:$0xff]  }
  0x83   :  { %1457 = vmatprep.mubr.bf16.mxu0 %v4200_v33 }
  0x84   :  { %1428 = vmatpush1.bf16.msra.mxu0 %v3568_v10  ;;  %v3659_v10 = vld [vmem:[#allocation5 + $0x128] ss:$16 sps:$4 sm:$0xff]  }
  0x85   :  { %1429 = vmatprep.subr.bf16.mxu0 %v3576_v12  ;;  %v3662_v12 = vld [vmem:[#allocation5 + $0x2e8] ss:$16 sps:$4 sm:$0xff]  }
  0x88   :  { %3238 = vmatmul.mubr.msk.bf16.vlgmr.msra.gmra.mxu1 %vm1335_vm0, %v3577_v14  ;;  %1430 = vmatpush1.bf16.msra.mxu0 %v3574_v15  ;;  %v3670_v14 = vld [vmem:[#allocation5 + $0x2cc] ss:$16 sps:$4 sm:$0xff]   ;;  %v3665_v15 = vld [vmem:[#allocation5 + $0x108] ss:$16 sps:$4 sm:$0xff]  }
  0x89   :  { %1512 = vmatpush1.bf16.msra.mxu1 %v3571_v13  ;;  %1431 = vmatprep.subr.bf16.mxu0 %v3583_v17  ;;  %v3667_v13 = vld [vmem:[#allocation5 + $0x10c] ss:$16 sps:$4 sm:$0xff]  }
  0x8a   :  { %1513 = vmatprep.subr.bf16.mxu1 %v3580_v16  ;;  %1543 = vmatprep.mubr.bf16.mxu1 %v4188_v49  ;;  %v3628_v49 = vld [vmem:[#allocation5 + $0x1cc] ss:$16 sps:$4 sm:$0xff]   ;;  %v3668_v16 = vld [vmem:[#allocation5 + $0x2c8] ss:$16 sps:$4 sm:$0xff]  }
  0x8b   :  { %v3673_v17 = vld [vmem:[#allocation5 + $0x4ec] ss:$16 sps:$4 sm:$0xff]  }
  0x8c   :  { %1432 = vmatpush1.bf16.msra.mxu0 %v3581_v19  ;;  %v3671_v19 = vld [vmem:[#allocation5 + $0x4e8] ss:$16 sps:$4 sm:$0xff]  }
  0x8d   :  { %1514 = vmatpush1.bf16.msra.mxu1 %v3578_v18  ;;  %1433 = vmatprep.subr.bf16.mxu0 %v3589_v21  ;;  %v3676_v18 = vld [vmem:[#allocation5 + $0x2ac] ss:$16 sps:$4 sm:$0xff]  }
  0x8e   :  { %1515 = vmatprep.subr.bf16.mxu1 %v3586_v20  ;;  %v3674_v20 = vld [vmem:[#allocation5 + $0x2a8] ss:$16 sps:$4 sm:$0xff]   ;;  %v3679_v21 = vld [vmem:[#allocation5 + $0x4cc] ss:$16 sps:$4 sm:$0xff]  }
  0x90   :  { %1434 = vmatpush1.bf16.msra.mxu0 %v3587_v23  ;;  %v3677_v23 = vld [vmem:[#allocation5 + $0x4c8] ss:$16 sps:$4 sm:$0xff]  }
  0x91   :  { %1516 = vmatpush1.bf16.msra.mxu1 %v3584_v22  ;;  %1435 = vmatprep.subr.bf16.mxu0 %v3595_v25  ;;  %v3682_v22 = vld [vmem:[#allocation5 + $0x28c] ss:$16 sps:$4 sm:$0xff]  }
  0x92   :  { %1517 = vmatprep.subr.bf16.mxu1 %v3592_v24  ;;  %v3680_v24 = vld [vmem:[#allocation5 + $0x288] ss:$16 sps:$4 sm:$0xff]   ;;  %v3685_v25 = vld [vmem:[#allocation5 + $0x4ac] ss:$16 sps:$4 sm:$0xff]  }
  0x94   :  { %1436 = vmatpush1.bf16.msra.mxu0 %v3593_v27  ;;  %v3683_v27 = vld [vmem:[#allocation5 + $0x4a8] ss:$16 sps:$4 sm:$0xff]  }
  0x95   :  { %1518 = vmatpush1.bf16.msra.mxu1 %v3590_v26  ;;  %1437 = vmatprep.subr.bf16.mxu0 %v3601_v29  ;;  %v3688_v26 = vld [vmem:[#allocation5 + $0x26c] ss:$16 sps:$4 sm:$0xff]  }
  0x96   :  { %1519 = vmatprep.subr.bf16.mxu1 %v3598_v28  ;;  %v3686_v28 = vld [vmem:[#allocation5 + $0x268] ss:$16 sps:$4 sm:$0xff]   ;;  %v3694_v29 = vld [vmem:[#allocation5 + $0x24c] ss:$16 sps:$4 sm:$0xff]  }
  0x98   :  { %1438 = vmatpush1.bf16.msra.mxu0 %v3599_v31  ;;  %v3697_v31 = vld [vmem:[#allocation5 + $0x46c] ss:$16 sps:$4 sm:$0xff]  }
  0x99   :  { %1520 = vmatpush1.bf16.msra.mxu1 %v3596_v30  ;;  %1439 = vmatprep.subr.bf16.mxu0 %v3607_v34  ;;  %v3689_v30 = vld [vmem:[#allocation5 + $0x488] ss:$16 sps:$4 sm:$0xff]  }
  0x9a   :  { %1521 = vmatprep.subr.bf16.mxu1 %v3604_v32  ;;  %v3700_v32 = vld [vmem:[#allocation5 + $0x22c] ss:$16 sps:$4 sm:$0xff]   ;;  %v3695_v34 = vld [vmem:[#allocation5 + $0x468] ss:$16 sps:$4 sm:$0xff]  }
  0x9c   :  { %1440 = vmatpush1.bf16.msra.mxu0 %v3605_v36  ;;  %v3706_v36 = vld [vmem:[#allocation5 + $0x20c] ss:$16 sps:$4 sm:$0xff]  }
  0x9d   :  { %1522 = vmatpush1.bf16.msra.mxu1 %v3602_v35  ;;  %1441 = vmatprep.subr.bf16.mxu0 %v3613_v38  ;;  %v3698_v35 = vld [vmem:[#allocation5 + $0x228] ss:$16 sps:$4 sm:$0xff]  }
  0x9e   :  { %1523 = vmatprep.subr.bf16.mxu1 %v3610_v37  ;;  %v3701_v37 = vld [vmem:[#allocation5 + $0x448] ss:$16 sps:$4 sm:$0xff]  }
  0x9f   :  { %v3704_v38 = vld [vmem:[#allocation5 + $0x208] ss:$16 sps:$4 sm:$0xff]  }
  0xa0   :  { %1442 = vmatpush2.bf16.msra.mxu0 %v3611_v40  ;;  %v3712_v40 = vld [vmem:[#allocation5 + $0x3ec] ss:$16 sps:$4 sm:$0xff]  }
  0xa1   :  { %1524 = vmatpush1.bf16.msra.mxu1 %v3608_v39  ;;  %1443 = vmatprep.subr.bf16.mxu0 %v3619_v42  ;;  %v3709_v39 = vld [vmem:[#allocation5 + $0x42c] ss:$16 sps:$4 sm:$0xff]   ;;  %v3710_v42 = vld [vmem:[#allocation5 + $0x3e8] ss:$16 sps:$4 sm:$0xff]  }
  0xa2   :  { %1525 = vmatprep.subr.bf16.mxu1 %v3616_v41  ;;  %v3707_v41 = vld [vmem:[#allocation5 + $0x428] ss:$16 sps:$4 sm:$0xff]  }
  0xa4   :  { %1444 = vmatpush2.bf16.msra.mxu0 %v3617_v44  ;;  %v3718_v44 = vld [vmem:[#allocation5 + $0x3cc] ss:$16 sps:$4 sm:$0xff]  }
  0xa5   :  { %1526 = vmatpush1.bf16.msra.mxu1 %v3614_v43  ;;  %1445 = vmatprep.subr.bf16.mxu0 %v3625_v46  ;;  %v3715_v43 = vld [vmem:[#allocation5 + $0x40c] ss:$16 sps:$4 sm:$0xff]   ;;  %v3716_v46 = vld [vmem:[#allocation5 + $0x3c8] ss:$16 sps:$4 sm:$0xff]  }
  0xa6   :  { %1527 = vmatprep.subr.bf16.mxu1 %v3622_v45  ;;  %v3713_v45 = vld [vmem:[#allocation5 + $0x408] ss:$16 sps:$4 sm:$0xff]  }
  0xa8   :  { %1446 = vmatpush2.bf16.msra.mxu0 %v3623_v48  ;;  %v3724_v48 = vld [vmem:[#allocation5 + $0x3ac] ss:$16 sps:$4 sm:$0xff]  }
  0xa9   :  { %1528 = vmatpush2.bf16.msra.mxu1 %v3620_v47  ;;  %1447 = vmatprep.subr.bf16.mxu0 %v3631_v50  ;;  %v3721_v47 = vld [vmem:[#allocation5 + $0x5ec] ss:$16 sps:$4 sm:$0xff]   ;;  %v3722_v50 = vld [vmem:[#allocation5 + $0x3a8] ss:$16 sps:$4 sm:$0xff]  }
  0xaa   :  { %1529 = vmatprep.subr.bf16.mxu1 %v3628_v49  ;;  %v3719_v49 = vld [vmem:[#allocation5 + $0x5e8] ss:$16 sps:$4 sm:$0xff]  }
  0xac   :  { %1448 = vmatpush2.bf16.msra.mxu0 %v3629_v53  ;;  %v3730_v53 = vld [vmem:[#allocation5 + $0x38c] ss:$16 sps:$4 sm:$0xff]  }
  0xad   :  { %1530 = vmatpush2.bf16.msra.mxu1 %v3626_v52  ;;  %1449 = vmatprep.subr.bf16.mxu0 %v3637_v55  ;;  %v3727_v52 = vld [vmem:[#allocation5 + $0x5cc] ss:$16 sps:$4 sm:$0xff]   ;;  %v3728_v55 = vld [vmem:[#allocation5 + $0x388] ss:$16 sps:$4 sm:$0xff]  }
  0xae   :  { %1531 = vmatprep.subr.bf16.mxu1 %v3634_v54  ;;  %v3725_v54 = vld [vmem:[#allocation5 + $0x5c8] ss:$16 sps:$4 sm:$0xff]  }
  0xb0   :  { %1450 = vmatpush2.bf16.msra.mxu0 %v3635_v57  ;;  %v3736_v57 = vld [vmem:[#allocation5 + $0x36c] ss:$16 sps:$4 sm:$0xff]  }
  0xb1   :  { %1532 = vmatpush2.bf16.msra.mxu1 %v3632_v56  ;;  %1451 = vmatprep.subr.bf16.mxu0 %v3643_v59  ;;  %v3733_v56 = vld [vmem:[#allocation5 + $0x5ac] ss:$16 sps:$4 sm:$0xff]   ;;  %v3734_v59 = vld [vmem:[#allocation5 + $0x368] ss:$16 sps:$4 sm:$0xff]  }
  0xb2   :  { %1533 = vmatprep.subr.bf16.mxu1 %v3640_v58  ;;  %v3731_v58 = vld [vmem:[#allocation5 + $0x5a8] ss:$16 sps:$4 sm:$0xff]  }
  0xb4   :  { %1452 = vmatpush2.bf16.msra.mxu0 %v3641_v61  ;;  %v3742_v61 = vld [vmem:[#allocation5 + $0x34c] ss:$16 sps:$4 sm:$0xff]  }
  0xb5   :  { %1534 = vmatpush2.bf16.msra.mxu1 %v3638_v60  ;;  %1453 = vmatprep.subr.bf16.mxu0 %v3649_v63  ;;  %v3739_v60 = vld [vmem:[#allocation5 + $0x58c] ss:$16 sps:$4 sm:$0xff]   ;;  %v3740_v63 = vld [vmem:[#allocation5 + $0x348] ss:$16 sps:$4 sm:$0xff]  }
  0xb6   :  { %1535 = vmatprep.subr.bf16.mxu1 %v3646_v62  ;;  %v3737_v62 = vld [vmem:[#allocation5 + $0x588] ss:$16 sps:$4 sm:$0xff]  }
  0xb8   :  { %1454 = vmatpush2.bf16.msra.mxu0 %v3647_v1  ;;  %v3748_v1 = vld [vmem:[#allocation5 + $0x32c] ss:$16 sps:$4 sm:$0xff]  }
  0xb9   :  { %1536 = vmatpush2.bf16.msra.mxu1 %v3644_v0  ;;  %1455 = vmatprep.subr.bf16.mxu0 %v3655_v3  ;;  %v3745_v0 = vld [vmem:[#allocation5 + $0x56c] ss:$16 sps:$4 sm:$0xff]   ;;  %v3746_v3 = vld [vmem:[#allocation5 + $0x328] ss:$16 sps:$4 sm:$0xff]  }
  0xba   :  { %1537 = vmatprep.subr.bf16.mxu1 %v3652_v2  ;;  %v3743_v2 = vld [vmem:[#allocation5 + $0x568] ss:$16 sps:$4 sm:$0xff]  }
  0xbc   :  { %1456 = vmatpush2.bf16.msra.mxu0 %v3653_v6  ;;  %v3754_v6 = vld [vmem:[#allocation5 + $0x30c] ss:$16 sps:$4 sm:$0xff]  }
  0xbd   :  { %1538 = vmatpush2.bf16.msra.mxu1 %v3650_v5  ;;  %1554 = vmatprep.subr.bf16.mxu0 %v3664_v8  ;;  %v3751_v5 = vld [vmem:[#allocation5 + $0x54c] ss:$16 sps:$4 sm:$0xff]   ;;  %v3752_v8 = vld [vmem:[#allocation5 + $0x308] ss:$16 sps:$4 sm:$0xff]  }
  0xbe   :  { %1539 = vmatprep.subr.bf16.mxu1 %v3661_v7  ;;  %v3749_v7 = vld [vmem:[#allocation5 + $0x548] ss:$16 sps:$4 sm:$0xff]  }
  0xbf   :  { %1458 = vmatmul.mubr.bf16.vlgmr.msra.gmra.mxu0 %v4203_v9 }
  0xc0   :  { %1555 = vmatpush1.bf16.msra.mxu0 %v3662_v12  ;;  %1586 = vmatprep.mubr.bf16.mxu0 %v4190_v51  ;;  %v3691_v51 = vld [vmem:[#allocation5 + $0x48c] ss:$16 sps:$4 sm:$0xff]  }
  0xc1   :  { %1540 = vmatpush2.bf16.msra.mxu1 %v3659_v10  ;;  %1556 = vmatprep.subr.bf16.mxu0 %v3670_v14  ;;  %v3757_v10 = vld [vmem:[#allocation5 + $0x52c] ss:$16 sps:$4 sm:$0xff]   ;;  %v3758_v14 = vld [vmem:[#allocation5 + $0x608] ss:$16 sps:$4 sm:$0xff]  }
  0xc2   :  { %1541 = vmatprep.subr.bf16.mxu1 %v3667_v13  ;;  %v3760_v12 = vld [vmem:[#allocation5 + $0x60c] ss:$16 sps:$4 sm:$0xff]   ;;  %v3755_v13 = vld [vmem:[#allocation5 + $0x528] ss:$16 sps:$4 sm:$0xff]  }
  0xc4   :  { %1557 = vmatpush1.bf16.msra.mxu0 %v3668_v16  ;;  %v3766_v16 = vld [vmem:[#allocation8 + $0xe4] ss:$16 sps:$4 sm:$0xff]  }
  0xc5   :  { %1542 = vmatpush2.bf16.msra.mxu1 %v3665_v15  ;;  %1558 = vmatprep.subr.bf16.mxu0 %v3676_v18  ;;  %v3763_v15 = vld [vmem:[#allocation5 + $0x50c] ss:$16 sps:$4 sm:$0xff]  }
  0xc6   :  { %1597 = vmatprep.subr.bf16.mxu1 %v3673_v17  ;;  %v3761_v17 = vld [vmem:[#allocation5 + $0x508] ss:$16 sps:$4 sm:$0xff]   ;;  %v3988_v18 = vld [vmem:[#allocation2 + $0x8] ss:$28 sps:$4 sm:$0xff]  }
  0xc8   :  { %1544 = vmatmul.mubr.bf16.vlgmr.msra.gmra.mxu1 %v4194_v4  ;;  %1559 = vmatpush1.bf16.msra.mxu0 %v3674_v20  ;;  %v3692_v4 = vld [vmem:[#allocation5 + $0x248] ss:$16 sps:$4 sm:$0xff]  }
  0xc9   :  { %1598 = vmatpush1.bf16.msra.mxu1 %v3671_v19  ;;  %1560 = vmatprep.subr.bf16.mxu0 %v3682_v22  ;;  %v3764_v19 = vld [vmem:[#allocation8 + $0xe0] ss:$16 sps:$4 sm:$0xff]   ;;  %v3769_v20 = vld [vmem:[#allocation8 + $0xc4] ss:$16 sps:$4 sm:$0xff]   ;;  %v3989_v22 = vld [vmem:[#allocation2 + $0x18] ss:$28 sps:$4 sm:$0xff]  }
  0xca   :  { %1599 = vmatprep.subr.bf16.mxu1 %v3679_v21  ;;  %1629 = vmatprep.mubr.bf16.mxu1 %v4200_v33  ;;  %v3703_v33 = vld [vmem:[#allocation5 + $0x44c] ss:$16 sps:$4 sm:$0xff]   ;;  %v3767_v21 = vld [vmem:[#allocation8 + $0xc0] ss:$16 sps:$4 sm:$0xff]  }
  0xcc   :  { %1561 = vmatpush1.bf16.msra.mxu0 %v3680_v24  ;;  %v3770_v24 = vld [vmem:[#allocation8 + $0xa0] ss:$16 sps:$4 sm:$0xff]  }
  0xcd   :  { %1600 = vmatpush1.bf16.msra.mxu1 %v3677_v23  ;;  %1562 = vmatprep.subr.bf16.mxu0 %v3688_v26  ;;  %v3772_v23 = vld [vmem:[#allocation8 + $0xa4] ss:$16 sps:$4 sm:$0xff]   ;;  %v3773_v26 = vld [vmem:[#allocation8 + $0x80] ss:$16 sps:$4 sm:$0xff]  }
  0xce   :  { %1601 = vmatprep.subr.bf16.mxu1 %v3685_v25  ;;  %v3775_v25 = vld [vmem:[#allocation8 + $0x84] ss:$16 sps:$4 sm:$0xff]  }
  0xd0   :  { %1563 = vmatpush1.bf16.msra.mxu0 %v3686_v28  ;;  %v3818_v28 = vld [vmem:[#allocation8 + $0x2e0] ss:$16 sps:$4 sm:$0xff]  }
  0xd1   :  { %1602 = vmatpush1.bf16.msra.mxu1 %v3683_v27  ;;  %1564 = vmatprep.subr.bf16.mxu0 %v3694_v29  ;;  %v3776_v27 = vld [vmem:[#allocation8 + $0x60] ss:$16 sps:$4 sm:$0xff]  }
  0xd2   :  { %1603 = vmatprep.subr.bf16.mxu1 %v3691_v51  ;;  %v3820_v51 = vld [vmem:[#allocation8 + $0x2e4] ss:$16 sps:$4 sm:$0xff]   ;;  %v3779_v29 = vld [vmem:[#allocation8 + $0x40] ss:$16 sps:$4 sm:$0xff]  }
  0xd4   :  { %1565 = vmatpush1.bf16.msra.mxu0 %v3692_v4  ;;  %v3826_v4 = vld [vmem:[#allocation8 + $0x2c4] ss:$16 sps:$4 sm:$0xff]  }
  0xd5   :  { %1604 = vmatpush1.bf16.msra.mxu1 %v3689_v30  ;;  %1566 = vmatprep.subr.bf16.mxu0 %v3700_v32  ;;  %v3824_v30 = vld [vmem:[#allocation8 + $0x2c0] ss:$16 sps:$4 sm:$0xff]  }
  0xd6   :  { %1605 = vmatprep.subr.bf16.mxu1 %v3697_v31  ;;  %v3784_v31 = vld [vmem:[#allocation8 + $0x24] ss:$16 sps:$4 sm:$0xff]   ;;  %v3782_v32 = vld [vmem:[#allocation8 + $0x20] ss:$16 sps:$4 sm:$0xff]  }
  0xd8   :  { %1567 = vmatpush1.bf16.msra.mxu0 %v3698_v35  ;;  %v3832_v35 = vld [vmem:[#allocation8 + $0x2a4] ss:$16 sps:$4 sm:$0xff]  }
  0xd9   :  { %1606 = vmatpush1.bf16.msra.mxu1 %v3695_v34  ;;  %1568 = vmatprep.subr.bf16.mxu0 %v3706_v36  ;;  %v3830_v34 = vld [vmem:[#allocation8 + $0x2a0] ss:$16 sps:$4 sm:$0xff]  }
  0xda   :  { %1607 = vmatprep.subr.bf16.mxu1 %v3703_v33  ;;  %v3787_v33 = vld [vmem:[#allocation8 + $0x4] ss:$16 sps:$4 sm:$0xff]   ;;  %v3785_v36 = vld [vmem:[#allocation8] ss:$16 sps:$4 sm:$0xff]  }
  0xdc   :  { %1569 = vmatpush1.bf16.msra.mxu0 %v3704_v38  ;;  %v3838_v38 = vld [vmem:[#allocation8 + $0x284] ss:$16 sps:$4 sm:$0xff]  }
  0xdd   :  { %1608 = vmatpush1.bf16.msra.mxu1 %v3701_v37  ;;  %1570 = vmatprep.subr.bf16.mxu0 %v3712_v40  ;;  %v3836_v37 = vld [vmem:[#allocation8 + $0x280] ss:$16 sps:$4 sm:$0xff]  }
  0xde   :  { %1609 = vmatprep.subr.bf16.mxu1 %v3709_v39  ;;  %v3790_v39 = vld [vmem:[#allocation8 + $0x1e4] ss:$16 sps:$4 sm:$0xff]   ;;  %v3788_v40 = vld [vmem:[#allocation8 + $0x1e0] ss:$16 sps:$4 sm:$0xff]  }
  0xe0   :  { %1571 = vmatpush2.bf16.msra.mxu0 %v3710_v42  ;;  %v3844_v42 = vld [vmem:[#allocation8 + $0x264] ss:$16 sps:$4 sm:$0xff]  }
  0xe1   :  { %1610 = vmatpush1.bf16.msra.mxu1 %v3707_v41  ;;  %1572 = vmatprep.subr.bf16.mxu0 %v3718_v44  ;;  %v3842_v41 = vld [vmem:[#allocation8 + $0x260] ss:$16 sps:$4 sm:$0xff]  }
  0xe2   :  { %1611 = vmatprep.subr.bf16.mxu1 %v3715_v43  ;;  %v3793_v43 = vld [vmem:[#allocation8 + $0x1c4] ss:$16 sps:$4 sm:$0xff]   ;;  %v3791_v44 = vld [vmem:[#allocation8 + $0x1c0] ss:$16 sps:$4 sm:$0xff]  }
  0xe4   :  { %1573 = vmatpush2.bf16.msra.mxu0 %v3716_v46  ;;  %v3850_v46 = vld [vmem:[#allocation8 + $0x244] ss:$16 sps:$4 sm:$0xff]  }
  0xe5   :  { %1612 = vmatpush1.bf16.msra.mxu1 %v3713_v45  ;;  %1574 = vmatprep.subr.bf16.mxu0 %v3724_v48  ;;  %v3848_v45 = vld [vmem:[#allocation8 + $0x240] ss:$16 sps:$4 sm:$0xff]  }
  0xe6   :  { %1613 = vmatprep.subr.bf16.mxu1 %v3721_v47  ;;  %v3796_v47 = vld [vmem:[#allocation8 + $0x1a4] ss:$16 sps:$4 sm:$0xff]   ;;  %v3794_v48 = vld [vmem:[#allocation8 + $0x1a0] ss:$16 sps:$4 sm:$0xff]  }
  0xe8   :  { %1575 = vmatpush2.bf16.msra.mxu0 %v3722_v50  ;;  %v3856_v50 = vld [vmem:[#allocation8 + $0x224] ss:$16 sps:$4 sm:$0xff]  }
  0xe9   :  { %1614 = vmatpush2.bf16.msra.mxu1 %v3719_v49  ;;  %1576 = vmatprep.subr.bf16.mxu0 %v3730_v53  ;;  %v3854_v49 = vld [vmem:[#allocation8 + $0x220] ss:$16 sps:$4 sm:$0xff]  }
  0xea   :  { %1615 = vmatprep.subr.bf16.mxu1 %v3727_v52  ;;  %v3799_v52 = vld [vmem:[#allocation8 + $0x184] ss:$16 sps:$4 sm:$0xff]   ;;  %v3797_v53 = vld [vmem:[#allocation8 + $0x180] ss:$16 sps:$4 sm:$0xff]  }
  0xec   :  { %1577 = vmatpush2.bf16.msra.mxu0 %v3728_v55  ;;  %v3862_v55 = vld [vmem:[#allocation8 + $0x204] ss:$16 sps:$4 sm:$0xff]  }
  0xed   :  { %1616 = vmatpush2.bf16.msra.mxu1 %v3725_v54  ;;  %1578 = vmatprep.subr.bf16.mxu0 %v3736_v57  ;;  %v3860_v54 = vld [vmem:[#allocation8 + $0x200] ss:$16 sps:$4 sm:$0xff]  }
  0xee   :  { %1617 = vmatprep.subr.bf16.mxu1 %v3733_v56  ;;  %v3802_v56 = vld [vmem:[#allocation8 + $0x164] ss:$16 sps:$4 sm:$0xff]   ;;  %v3800_v57 = vld [vmem:[#allocation8 + $0x160] ss:$16 sps:$4 sm:$0xff]  }
  0xf0   :  { %1579 = vmatpush2.bf16.msra.mxu0 %v3734_v59  ;;  %v3868_v59 = vld [vmem:[#allocation8 + $0x3e4] ss:$16 sps:$4 sm:$0xff]  }
  0xf1   :  { %1618 = vmatpush2.bf16.msra.mxu1 %v3731_v58  ;;  %1580 = vmatprep.subr.bf16.mxu0 %v3742_v61  ;;  %v3866_v58 = vld [vmem:[#allocation8 + $0x3e0] ss:$16 sps:$4 sm:$0xff]  }
  0xf2   :  { %1619 = vmatprep.subr.bf16.mxu1 %v3739_v60  ;;  %v3805_v60 = vld [vmem:[#allocation8 + $0x144] ss:$16 sps:$4 sm:$0xff]   ;;  %v3803_v61 = vld [vmem:[#allocation8 + $0x140] ss:$16 sps:$4 sm:$0xff]  }
  0xf4   :  { %1581 = vmatpush2.bf16.msra.mxu0 %v3740_v63  ;;  %v3874_v63 = vld [vmem:[#allocation8 + $0x3c4] ss:$16 sps:$4 sm:$0xff]  }
  0xf5   :  { %1620 = vmatpush2.bf16.msra.mxu1 %v3737_v62  ;;  %1582 = vmatprep.subr.bf16.mxu0 %v3748_v1  ;;  %v3872_v62 = vld [vmem:[#allocation8 + $0x3c0] ss:$16 sps:$4 sm:$0xff]  }
  0xf6   :  { %1621 = vmatprep.subr.bf16.mxu1 %v3745_v0  ;;  %v3808_v0 = vld [vmem:[#allocation8 + $0x124] ss:$16 sps:$4 sm:$0xff]   ;;  %v3806_v1 = vld [vmem:[#allocation8 + $0x120] ss:$16 sps:$4 sm:$0xff]  }
  0xf8   :  { %1583 = vmatpush2.bf16.msra.mxu0 %v3746_v3  ;;  %v3880_v3 = vld [vmem:[#allocation8 + $0x3a4] ss:$16 sps:$4 sm:$0xff]  }
  0xf9   :  { %1622 = vmatpush2.bf16.msra.mxu1 %v3743_v2  ;;  %1584 = vmatprep.subr.bf16.mxu0 %v3754_v6  ;;  %v3878_v2 = vld [vmem:[#allocation8 + $0x3a0] ss:$16 sps:$4 sm:$0xff]  }
  0xfa   :  { %1623 = vmatprep.subr.bf16.mxu1 %v3751_v5  ;;  %v3811_v5 = vld [vmem:[#allocation8 + $0x104] ss:$16 sps:$4 sm:$0xff]   ;;  %v3809_v6 = vld [vmem:[#allocation8 + $0x100] ss:$16 sps:$4 sm:$0xff]  }
  0xfc   :  { %1585 = vmatpush2.bf16.msra.mxu0 %v3752_v8  ;;  %v3814_v8 = vld [vmem:[#allocation8 + $0xec] ss:$16 sps:$4 sm:$0xff]  }
  0xfd   :  { %1624 = vmatpush2.bf16.msra.mxu1 %v3749_v7  ;;  %1654 = vmatprep.subr.bf16.mxu0 %v3760_v12  ;;  %v3886_v7 = vld [vmem:[#allocation8 + $0x384] ss:$16 sps:$4 sm:$0xff]  }
  0xfe   :  { %1625 = vmatprep.subr.bf16.mxu1 %v3757_v10  ;;  %v3884_v10 = vld [vmem:[#allocation8 + $0x380] ss:$16 sps:$4 sm:$0xff]   ;;  %v3892_v12 = vld [vmem:[#allocation8 + $0x364] ss:$16 sps:$4 sm:$0xff]  }
  0xff   :  { %1587 = vmatmul.mubr.bf16.vlgmr.msra.gmra.mxu0 %v3988_v18  ;;  %v3907_v18 = vld [vmem:[#allocation8 + $0x304] ss:$16 sps:$4 sm:$0xff]  }
 0x100   :  { %1655 = vmatpush1.bf16.msra.mxu0 %v3758_v14  ;;  %1672 = vmatprep.mubr.bf16.mxu0 %v4129_v11  ;;  %v3778_v11 = vld [vmem:[#allocation8 + $0x64] ss:$16 sps:$4 sm:$0xff]  }
 0x101   :  { %1626 = vmatpush2.bf16.msra.mxu1 %v3755_v13  ;;  %2485 = vmatprep.subr.bf16.mxu0 %v3766_v16  ;;  %v3890_v13 = vld [vmem:[#allocation8 + $0x360] ss:$16 sps:$4 sm:$0xff]   ;;  %v3898_v14 = vld [vmem:[#allocation8 + $0x344] ss:$16 sps:$4 sm:$0xff]  }
 0x102   :  { %1627 = vmatprep.subr.bf16.mxu1 %v3763_v15  ;;  %v3896_v15 = vld [vmem:[#allocation8 + $0x340] ss:$16 sps:$4 sm:$0xff]   ;;  %v3904_v16 = vld [vmem:[#allocation8 + $0x324] ss:$16 sps:$4 sm:$0xff]  }
 0x105   :  { %1628 = vmatpush2.bf16.msra.mxu1 %v3761_v17  ;;  %v3902_v17 = vld [vmem:[#allocation8 + $0x320] ss:$16 sps:$4 sm:$0xff]  }
 0x106   :  { %2528 = vmatprep.subr.bf16.mxu1 %v3820_v51  ;;  %v4216_v51 = vld [vmem:[#allocation7] sm:$0xf] }
 0x107   :  { %3239 = vmatmul.mubr.msk.bf16.vlgmr.msra.gmra.mxu0 %vm1335_vm0, %v3989_v22  ;;  %v300_v22 = vlaneseq }
 0x108   :  { %1630 = vmatmul.mubr.bf16.vlgmr.msra.gmra.mxu1 %v4203_v9  ;;  %2486 = vmatpush1.bf16.msra.mxu0 %v3764_v19  ;;  %v3781_v9 = vld [vmem:[#allocation8 + $0x44] ss:$16 sps:$4 sm:$0xff]   ;;  %v3905_v19 = vld [vmem:[#allocation8 + $0x300] ss:$16 sps:$4 sm:$0xff]  }
 0x109   :  { %2487 = vmatprep.subr.bf16.mxu0 %v3769_v20  ;;  %2529 = vmatpush1.bf16.msra.mxu1 %v3818_v28  ;;  %v3910_v20 = vld [vmem:[#allocation8 + $0x2ec] ss:$16 sps:$4 sm:$0xff]  }
 0x10a   :  { %2530 = vmatprep.subr.bf16.mxu1 %v3826_v4 }
 0x10c   :  { %2488 = vmatpush1.bf16.msra.mxu0 %v3767_v21 }
 0x10d   :  { %2489 = vmatprep.subr.bf16.mxu0 %v3772_v23  ;;  %2531 = vmatpush1.bf16.msra.mxu1 %v3824_v30 }
 0x10e   :  { %2532 = vmatprep.subr.bf16.mxu1 %v3832_v35 }
 0x110   :  { %2490 = vmatpush1.bf16.msra.mxu0 %v3770_v24  ;;  %v4212_v24 = vshrl.u32 %v300_v22, 7  ;;  %v3869_v22 = vld [vmem:[#allocation8 + $0x1a8] ss:$16 sps:$4 sm:$0xff]  }
 0x111   :  { %2491 = vmatprep.subr.bf16.mxu0 %v3775_v25  ;;  %2533 = vmatpush1.bf16.msra.mxu1 %v3830_v34 }
 0x112   :  { %2534 = vmatprep.subr.bf16.mxu1 %v3838_v38 }
 0x114   :  { %2492 = vmatpush1.bf16.msra.mxu0 %v3773_v26 }
 0x115   :  { %2493 = vmatprep.subr.bf16.mxu0 %v3778_v11  ;;  %2535 = vmatpush1.bf16.msra.mxu1 %v3836_v37  ;;  %v306_v11 = vsub.s32 1, %v4212_v24 }
 0x116   :  { %2536 = vmatprep.subr.bf16.mxu1 %v3844_v42 }
 0x118   :  { %2494 = vmatpush1.bf16.msra.mxu0 %v3776_v27  ;;  %v302_v27 = vsub.s32 0, %v4212_v24 }
 0x119   :  { %2495 = vmatprep.subr.bf16.mxu0 %v3781_v9  ;;  %2537 = vmatpush1.bf16.msra.mxu1 %v3842_v41 }
 0x11a   :  { %2538 = vmatprep.subr.bf16.mxu1 %v3850_v46  ;;  %v303_v30 = vrot.slane %v4216_v51, %v302_v27 }
 0x11c   :  { %2496 = vmatpush1.bf16.msra.mxu0 %v3779_v29  ;;  %v307_v29 = vrot.slane %v4216_v51, %v306_v11 }
 0x11d   :  { %2497 = vmatprep.subr.bf16.mxu0 %v3784_v31  ;;  %2539 = vmatpush1.bf16.msra.mxu1 %v3848_v45 }
 0x11e   :  { %2540 = vmatprep.subr.bf16.mxu1 %v3856_v50 }
 0x120   :  { %2498 = vmatpush1.bf16.msra.mxu0 %v3782_v32 }
 0x121   :  { %2499 = vmatprep.subr.bf16.mxu0 %v3787_v33  ;;  %2541 = vmatpush1.bf16.msra.mxu1 %v3854_v49 }
 0x122   :  { %2542 = vmatprep.subr.bf16.mxu1 %v3862_v55 }
 0x124   :  { %2500 = vmatpush1.bf16.msra.mxu0 %v3785_v36 }
 0x125   :  { %2501 = vmatprep.subr.bf16.mxu0 %v3790_v39  ;;  %2543 = vmatpush1.bf16.msra.mxu1 %v3860_v54 }
 0x126   :  { %2544 = vmatprep.subr.bf16.mxu1 %v3868_v59 }
 0x128   :  { %2502 = vmatpush2.bf16.msra.mxu0 %v3788_v40 }
 0x129   :  { %2503 = vmatprep.subr.bf16.mxu0 %v3793_v43  ;;  %2545 = vmatpush2.bf16.msra.mxu1 %v3866_v58 }
 0x12a   :  { %2546 = vmatprep.subr.bf16.mxu1 %v3874_v63 }
 0x12c   :  { %2504 = vmatpush2.bf16.msra.mxu0 %v3791_v44 }
 0x12d   :  { %2505 = vmatprep.subr.bf16.mxu0 %v3796_v47  ;;  %2547 = vmatpush2.bf16.msra.mxu1 %v3872_v62  ;;  %v3812_v62 = vld [vmem:[#allocation8 + $0xe8] ss:$16 sps:$4 sm:$0xff]  }
 0x12e   :  { %2548 = vmatprep.subr.bf16.mxu1 %v3880_v3  ;;  %v3821_v3 = vld [vmem:[#allocation8 + $0xa8] ss:$16 sps:$4 sm:$0xff]  }
 0x130   :  { %2506 = vmatpush2.bf16.msra.mxu0 %v3794_v48 }
 0x131   :  { %2507 = vmatprep.subr.bf16.mxu0 %v3799_v52  ;;  %2549 = vmatpush2.bf16.msra.mxu1 %v3878_v2  ;;  %v3823_v2 = vld [vmem:[#allocation8 + $0xac] ss:$16 sps:$4 sm:$0xff]  }
 0x132   :  { %2550 = vmatprep.subr.bf16.mxu1 %v3886_v7  ;;  %v3835_v7 = vld [vmem:[#allocation8 + $0x6c] ss:$16 sps:$4 sm:$0xff]  }
 0x134   :  { %2508 = vmatpush2.bf16.msra.mxu0 %v3797_v53 }
 0x135   :  { %2509 = vmatprep.subr.bf16.mxu0 %v3802_v56  ;;  %2551 = vmatpush2.bf16.msra.mxu1 %v3884_v10  ;;  %v3841_v10 = vld [vmem:[#allocation8 + $0x4c] ss:$16 sps:$4 sm:$0xff]  }
 0x136   :  { %2552 = vmatprep.subr.bf16.mxu1 %v3892_v12  ;;  %v3839_v12 = vld [vmem:[#allocation8 + $0x48] ss:$16 sps:$4 sm:$0xff]  }
 0x138   :  { %2510 = vmatpush2.bf16.msra.mxu0 %v3800_v57 }
 0x139   :  { %2511 = vmatprep.subr.bf16.mxu0 %v3805_v60  ;;  %2553 = vmatpush2.bf16.msra.mxu1 %v3890_v13  ;;  %v3847_v13 = vld [vmem:[#allocation8 + $0x2c] ss:$16 sps:$4 sm:$0xff]  }
 0x13a   :  { %2554 = vmatprep.subr.bf16.mxu1 %v3898_v14  ;;  %v3845_v14 = vld [vmem:[#allocation8 + $0x28] ss:$16 sps:$4 sm:$0xff]  }
 0x13c   :  { %2512 = vmatpush2.bf16.msra.mxu0 %v3803_v61 }
 0x13d   :  { %2513 = vmatprep.subr.bf16.mxu0 %v3808_v0  ;;  %2555 = vmatpush2.bf16.msra.mxu1 %v3896_v15  ;;  %v3817_v0 = vld [vmem:[#allocation8 + $0xcc] ss:$16 sps:$4 sm:$0xff]  }
 0x13e   :  { %2556 = vmatprep.subr.bf16.mxu1 %v3904_v16  ;;  %v3853_v15 = vld [vmem:[#allocation8 + $0xc] ss:$16 sps:$4 sm:$0xff]   ;;  %v3851_v16 = vld [vmem:[#allocation8 + $0x8] ss:$16 sps:$4 sm:$0xff]  }
 0x13f   :  { %v1373_v25 = vpop.f32.mrf.mxu0 }
 0x140   :  { %2514 = vmatpush2.bf16.msra.mxu0 %v3806_v1  ;;  %v1416_v21 = vpop.f32.mrf.mxu1  ;;  %v1374_v34 = vadd.f32 %v1373_v25, %v303_v30  ;;  %v3815_v1 = vld [vmem:[#allocation8 + $0xc8] ss:$16 sps:$4 sm:$0xff]  }
 0x141   :  { %2515 = vmatprep.subr.bf16.mxu0 %v3811_v5  ;;  %2557 = vmatpush2.bf16.msra.mxu1 %v3902_v17  ;;  %v1375_v28 = vpop.f32.mrf.mxu0  ;;  %v3829_v5 = vld [vmem:[#allocation8 + $0x8c] ss:$16 sps:$4 sm:$0xff]   ;;  %v3875_v25 = vld [vmem:[#allocation8 + $0x188] ss:$16 sps:$4 sm:$0xff]  }
 0x142   :  { %2558 = vmatprep.subr.bf16.mxu1 %v3907_v18  ;;  %v1418_v23 = vpop.f32.mrf.mxu1  ;;  %v1376_v32 = vadd.f32 %v1375_v28, %v307_v29  ;;  %v1417_v40 = vadd.f32 %v1416_v21, %v1374_v34  ;;  %v3859_v17 = vld [vmem:[#allocation8 + $0x1ec] ss:$16 sps:$4 sm:$0xff]   ;;  %v3857_v18 = vld [vmem:[#allocation8 + $0x1e8] ss:$16 sps:$4 sm:$0xff]  }
 0x143   :  { %v1377_v4 = vpop.f32.mrf.mxu0  ;;  %v3871_v21 = vld [vmem:[#allocation8 + $0x1ac] ss:$16 sps:$4 sm:$0xff]   ;;  %v3887_v34 = vld [vmem:[#allocation8 + $0x148] ss:$16 sps:$4 sm:$0xff]  }
 0x144   :  { %2516 = vmatpush2.bf16.msra.mxu0 %v3809_v6  ;;  %v1420_v26 = vpop.f32.mrf.mxu1  ;;  %v1378_v33 = vadd.f32 %v1377_v4, %v303_v30  ;;  %v1419_v38 = vadd.f32 %v1418_v23, %v1376_v32  ;;  %v3827_v6 = vld [vmem:[#allocation8 + $0x88] ss:$16 sps:$4 sm:$0xff]   ;;  %v3877_v23 = vld [vmem:[#allocation8 + $0x18c] ss:$16 sps:$4 sm:$0xff]   ;;  %v314_v4 = vsub.s32 3, %v4212_v24 }
 0x145   :  { %2571 = vmatprep.subr.bf16.mxu0 %v3814_v8  ;;  %2559 = vmatpush2.bf16.msra.mxu1 %v3905_v19  ;;  %v1379_v35 = vpop.f32.mrf.mxu0  ;;  %v3833_v8 = vld [vmem:[#allocation8 + $0x68] ss:$16 sps:$4 sm:$0xff]   ;;  %v3865_v19 = vld [vmem:[#allocation8 + $0x1cc] ss:$16 sps:$4 sm:$0xff]  }
 0x146   :  { %2614 = vmatprep.subr.bf16.mxu1 %v3910_v20  ;;  %v1422_v9 = vpop.f32.mrf.mxu1  ;;  %v1380_v39 = vadd.f32 %v1379_v35, %v307_v29  ;;  %v1421_v42 = vadd.f32 %v1420_v26, %v1378_v33  ;;  %v3863_v20 = vld [vmem:[#allocation8 + $0x1c8] ss:$16 sps:$4 sm:$0xff]   ;;  %v3883_v28 = vld [vmem:[#allocation8 + $0x16c] ss:$16 sps:$4 sm:$0xff]  }
 0x147   :  { %v3889_v30 = vld [vmem:[#allocation8 + $0x14c] ss:$16 sps:$4 sm:$0xff]  }
 0x148   :  { %v1502_v31 = vpop.f32.mrf.mxu1  ;;  %v1423_v47 = vadd.f32 %v1422_v9, %v1380_v39  ;;  %v3881_v9 = vld [vmem:[#allocation8 + $0x168] ss:$16 sps:$4 sm:$0xff]  }
 0x14a   :  { %v1504_v36 = vpop.f32.mrf.mxu1 }
 0x14c   :  { %v1506_v44 = vpop.f32.mrf.mxu1 }
 0x14e   :  { %v1508_v54 = vpop.f32.mrf.mxu1 }
 0x17f   :  { %v1459_v37 = vpop.f32.mrf.mxu0 }
 0x180   :  { %v1460_v45 = vadd.f32 %v1459_v37, %v1417_v40  ;;  %v315_v37 = vrot.slane %v4216_v51, %v314_v4  ;;  %v3893_v40 = vld [vmem:[#allocation8 + $0x128] ss:$16 sps:$4 sm:$0xff]  }
 0x181   :  { %v1461_v41 = vpop.f32.mrf.mxu0 }
 0x182   :  { %v1462_v43 = vadd.f32 %v1461_v41, %v1419_v38  ;;  %v1503_v55 = vadd.f32 %v1502_v31, %v1460_v45  ;;  %v310_v31 = vsub.s32 2, %v4212_v24 }
 0x183   :  { %v1463_v46 = vpop.f32.mrf.mxu0 }
 0x184   :  { %v1464_v48 = vadd.f32 %v1463_v46, %v1421_v42  ;;  %v1505_v50 = vadd.f32 %v1504_v36, %v1462_v43  ;;  %v1683_v60 = vmax.f32 %v1503_v55, 0.0  ;;  %v3895_v36 = vld [vmem:[#allocation8 + $0x12c] ss:$16 sps:$4 sm:$0xff]   ;;  %v311_v38 = vrot.slane %v4216_v51, %v310_v31 }
 0x185   :  { %v1465_v49 = vpop.f32.mrf.mxu0  ;;  %v3901_v43 = vld [vmem:[#allocation8 + $0x10c] ss:$16 sps:$4 sm:$0xff]  }
 0x186   :  { %v1507_v52 = vadd.f32 %v1506_v44, %v1464_v48  ;;  %v1466_v53 = vadd.f32 %v1465_v49, %v1423_v47  ;;  %v1684_v58 = vmax.f32 %v1505_v50, 0.0  ;;  %v3899_v50 = vld [vmem:[#allocation8 + $0x108] ss:$16 sps:$4 sm:$0xff]  }
 0x188   :  { %v1509_v56 = vadd.f32 %v1508_v54, %v1466_v53  ;;  %v1687_v57 = vmax.f32 %v1507_v52, 0.0  ;;  %v1545_v26 = vpop.f32.mrf.mxu1 }
 0x189   :  { %v1546_v45 = vadd.f32 %v1545_v26, %v311_v38  ;;  %v3961_v26 = vld [vmem:[#allocation10 + $0x28] sm:$0xff]  }
 0x18a   :  { %v1688_v59 = vmax.f32 %v1509_v56, 0.0  ;;  %v4224_v63 = vpack.c.bf16 %v1687_v57, %v1683_v60  ;;  %v1547_v29 = vpop.f32.mrf.mxu1 }
 0x18b   :  { %v1548_v44 = vadd.f32 %v1547_v29, %v315_v37  ;;  %v3920_v29 = vld [vmem:[#allocation8 + $0x268] ss:$16 sps:$4 sm:$0xff]  }
 0x18c   :  { %v1692_v61 = vpack.c.bf16 %v1688_v59, %v1684_v58  ;;  %v1549_v35 = vpop.f32.mrf.mxu1 }
 0x18d   :  { %v1550_v48 = vadd.f32 %v1549_v35, %v311_v38  ;;  %v3926_v35 = vld [vmem:[#allocation8 + $0x228] ss:$16 sps:$4 sm:$0xff]  }
 0x18e   :  { %2517 = vmatprep.mubr.bf16.mxu0 %v1692_v61  ;;  %v1551_v41 = vpop.f32.mrf.mxu1  ;;  %v3932_v38 = vld [vmem:[#allocation8 + $0x3e8] ss:$16 sps:$4 sm:$0xff]  }
 0x18f   :  { %2518 = vmatmul.mubr.bf16.vlgmr.msra.gmra.mxu0 %v4224_v63  ;;  %v1552_v51 = vadd.f32 %v1551_v41, %v315_v37  ;;  %v3934_v37 = vld [vmem:[#allocation8 + $0x3ec] ss:$16 sps:$4 sm:$0xff]  }
 0x190   :  { %2572 = vmatpush1.bf16.msra.mxu0 %v3812_v62  ;;  %2603 = vmatprep.mubr.bf16.mxu0 %v1692_v61  ;;  %v3940_v41 = vld [vmem:[#allocation8 + $0x3ac] ss:$16 sps:$4 sm:$0xff]  }
 0x191   :  { %2573 = vmatprep.subr.bf16.mxu0 %v3817_v0 }
 0x194   :  { %2574 = vmatpush1.bf16.msra.mxu0 %v3815_v1 }
 0x195   :  { %2575 = vmatprep.subr.bf16.mxu0 %v3823_v2 }
 0x198   :  { %2576 = vmatpush1.bf16.msra.mxu0 %v3821_v3 }
 0x199   :  { %2577 = vmatprep.subr.bf16.mxu0 %v3829_v5 }
 0x19c   :  { %2578 = vmatpush1.bf16.msra.mxu0 %v3827_v6 }
 0x19d   :  { %2579 = vmatprep.subr.bf16.mxu0 %v3835_v7 }
 0x1a0   :  { %2580 = vmatpush1.bf16.msra.mxu0 %v3833_v8 }
 0x1a1   :  { %2581 = vmatprep.subr.bf16.mxu0 %v3841_v10 }
 0x1a4   :  { %2582 = vmatpush1.bf16.msra.mxu0 %v3839_v12 }
 0x1a5   :  { %2583 = vmatprep.subr.bf16.mxu0 %v3847_v13 }
 0x1a8   :  { %2584 = vmatpush1.bf16.msra.mxu0 %v3845_v14  ;;  %v3908_v14 = vld [vmem:[#allocation8 + $0x2e8] ss:$16 sps:$4 sm:$0xff]  }
 0x1a9   :  { %2585 = vmatprep.subr.bf16.mxu0 %v3853_v15 }
 0x1ac   :  { %2586 = vmatpush1.bf16.msra.mxu0 %v3851_v16  ;;  %v3913_v16 = vld [vmem:[#allocation8 + $0x2cc] ss:$16 sps:$4 sm:$0xff]  }
 0x1ad   :  { %2587 = vmatprep.subr.bf16.mxu0 %v3859_v17  ;;  %v3956_v17 = vld [vmem:[#allocation10 + $0x78] sm:$0xff]  }
 0x1b0   :  { %2588 = vmatpush2.bf16.msra.mxu0 %v3857_v18  ;;  %v3957_v18 = vld [vmem:[#allocation10 + $0x38] sm:$0xff]  }
 0x1b1   :  { %2589 = vmatprep.subr.bf16.mxu0 %v3865_v19  ;;  %v3958_v19 = vld [vmem:[#allocation10 + $0x70] sm:$0xff]  }
 0x1b4   :  { %2590 = vmatpush2.bf16.msra.mxu0 %v3863_v20  ;;  %v3911_v20 = vld [vmem:[#allocation8 + $0x2c8] ss:$16 sps:$4 sm:$0xff]  }
 0x1b5   :  { %2591 = vmatprep.subr.bf16.mxu0 %v3871_v21  ;;  %v3959_v21 = vld [vmem:[#allocation10 + $0x30] sm:$0xff]  }
 0x1b8   :  { %2592 = vmatpush2.bf16.msra.mxu0 %v3869_v22  ;;  %v3960_v22 = vld [vmem:[#allocation10 + $0x68] sm:$0xff]  }
 0x1b9   :  { %2593 = vmatprep.subr.bf16.mxu0 %v3877_v23  ;;  %v3914_v23 = vld [vmem:[#allocation8 + $0x2a8] ss:$16 sps:$4 sm:$0xff]  }
 0x1bc   :  { %2594 = vmatpush2.bf16.msra.mxu0 %v3875_v25  ;;  %v3919_v25 = vld [vmem:[#allocation8 + $0x28c] ss:$16 sps:$4 sm:$0xff]  }
 0x1bd   :  { %2595 = vmatprep.subr.bf16.mxu0 %v3883_v28  ;;  %v3917_v28 = vld [vmem:[#allocation8 + $0x288] ss:$16 sps:$4 sm:$0xff]  }
 0x1bf   :  { %v1588_v32 = vpop.f32.mrf.mxu0 }
 0x1c0   :  { %2596 = vmatpush2.bf16.msra.mxu0 %v3881_v9  ;;  %v1589_v52 = vadd.f32 %v1588_v32, %v1546_v45  ;;  %v3922_v9 = vld [vmem:[#allocation8 + $0x26c] ss:$16 sps:$4 sm:$0xff]   ;;  %v3923_v32 = vld [vmem:[#allocation8 + $0x248] ss:$16 sps:$4 sm:$0xff]  }
 0x1c1   :  { %v1590_v33 = vpop.f32.mrf.mxu0  ;;  %2597 = vmatprep.subr.bf16.mxu0 %v3889_v30  ;;  %v3925_v30 = vld [vmem:[#allocation8 + $0x24c] ss:$16 sps:$4 sm:$0xff]  }
 0x1c2   :  { %v1591_v49 = vadd.f32 %v1590_v33, %v1548_v44  ;;  %v3931_v33 = vld [vmem:[#allocation8 + $0x20c] ss:$16 sps:$4 sm:$0xff]   ;;  %v3941_v44 = vld [vmem:[#allocation8 + $0x388] ss:$16 sps:$4 sm:$0xff]  }
 0x1c3   :  { %v1592_v39 = vpop.f32.mrf.mxu0  ;;  %v3946_v45 = vld [vmem:[#allocation8 + $0x36c] ss:$16 sps:$4 sm:$0xff]  }
 0x1c4   :  { %2598 = vmatpush2.bf16.msra.mxu0 %v3887_v34  ;;  %v1593_v55 = vadd.f32 %v1592_v39, %v1550_v48  ;;  %v3928_v34 = vld [vmem:[#allocation8 + $0x22c] ss:$16 sps:$4 sm:$0xff]   ;;  %v3947_v48 = vld [vmem:[#allocation8 + $0x348] ss:$16 sps:$4 sm:$0xff]  }
 0x1c5   :  { %v1594_v42 = vpop.f32.mrf.mxu0  ;;  %2599 = vmatprep.subr.bf16.mxu0 %v3895_v36  ;;  %v3929_v36 = vld [vmem:[#allocation8 + $0x208] ss:$16 sps:$4 sm:$0xff]   ;;  %v3937_v39 = vld [vmem:[#allocation8 + $0x3cc] ss:$16 sps:$4 sm:$0xff]  }
 0x1c6   :  { %v1595_v60 = vadd.f32 %v1594_v42, %v1552_v51  ;;  %v3938_v42 = vld [vmem:[#allocation8 + $0x3a8] ss:$16 sps:$4 sm:$0xff]   ;;  %v3963_v51 = vld [vmem:[#allocation10 + $0x20] sm:$0xff]  }
 0x1c7   :  { %v1674_v47 = vpop.f32.mrf.mxu0 }
 0x1c8   :  { %v1631_v46 = vpop.f32.mrf.mxu1  ;;  %2600 = vmatpush2.bf16.msra.mxu0 %v3893_v40  ;;  %v3935_v40 = vld [vmem:[#allocation8 + $0x3c8] ss:$16 sps:$4 sm:$0xff]  }
 0x1c9   :  { %v1676_v54 = vpop.f32.mrf.mxu0  ;;  %2601 = vmatprep.subr.bf16.mxu0 %v3901_v43  ;;  %v1632_v57 = vadd.f32 %v1631_v46, %v1589_v52  ;;  %v3943_v43 = vld [vmem:[#allocation8 + $0x38c] ss:$16 sps:$4 sm:$0xff]   ;;  %v3944_v46 = vld [vmem:[#allocation8 + $0x368] ss:$16 sps:$4 sm:$0xff]  }
 0x1ca   :  { %v1633_v53 = vpop.f32.mrf.mxu1  ;;  %v3955_v52 = vld [vmem:[#allocation8 + $0x30c] ss:$16 sps:$4 sm:$0xff]  }
 0x1cb   :  { %v1634_v56 = vadd.f32 %v1633_v53, %v1591_v49  ;;  %v1678_v59 = vpop.f32.mrf.mxu0  ;;  %v1675_v5 = vadd.f32 %v1674_v47, %v1632_v57  ;;  %v3949_v47 = vld [vmem:[#allocation8 + $0x34c] ss:$16 sps:$4 sm:$0xff]   ;;  %v3953_v53 = vld [vmem:[#allocation8 + $0x308] ss:$16 sps:$4 sm:$0xff]   ;;  %v3966_v57 = vld [vmem:[#allocation10 + $0x50] sm:$0xff]  }
 0x1cc   :  { %v1635_v58 = vpop.f32.mrf.mxu1  ;;  %2602 = vmatpush2.bf16.msra.mxu0 %v3899_v50  ;;  %v3952_v49 = vld [vmem:[#allocation8 + $0x32c] ss:$16 sps:$4 sm:$0xff]   ;;  %v3950_v50 = vld [vmem:[#allocation8 + $0x328] ss:$16 sps:$4 sm:$0xff]  }
 0x1cd   :  { %v1636_v61 = vadd.f32 %v1635_v58, %v1593_v55  ;;  %v1680_v0 = vpop.f32.mrf.mxu0  ;;  %v1677_v1 = vadd.f32 %v1676_v54, %v1634_v56  ;;  %v1685_v12 = vmax.f32 %v1675_v5, 0.0  ;;  %3401 = vmatprep.subr.bf16.mxu0 %v3956_v17  ;;  %v3962_v54 = vld [vmem:[#allocation10 + $0x60] sm:$0xff]   ;;  %v3964_v55 = vld [vmem:[#allocation10 + $0x58] sm:$0xff]   ;;  %v3967_v58 = vld [vmem:[#allocation10 + $0x10] sm:$0xff]  }
 0x1ce   :  { %v1637_v62 = vpop.f32.mrf.mxu1  ;;  %v3965_v56 = vld [vmem:[#allocation10 + $0x18] sm:$0xff]   ;;  %v3976_v5 = vld [vmem:[#allocation10 + $0xe8] sm:$0xff]   ;;  %v3986_v17 = vld [vmem:[#allocation10 + $0xc0] sm:$0xff]  }
 0x1cf   :  { %v1679_v2 = vadd.f32 %v1678_v59, %v1636_v61  ;;  %v1638_v3 = vadd.f32 %v1637_v62, %v1595_v60  ;;  %2604 = vmatmul.mubr.bf16.vlgmr.msra.gmra.mxu0 %v4224_v63  ;;  %v1686_v8 = vmax.f32 %v1677_v1, 0.0  ;;  %v3916_v63 = vld [vmem:[#allocation8 + $0x2ac] ss:$16 sps:$4 sm:$0xff]   ;;  %v3970_v61 = vld [vmem:[#allocation10 + $0x40] sm:$0xff]  }
 0x1d0   :  { %3402 = vmatpush3.bf16.msra.mxu0 %v3957_v18  ;;  %v3968_v59 = vld [vmem:[#allocation10 + $0x48] sm:$0xff]   ;;  %v3971_v62 = vld [vmem:[#allocation10] sm:$0xff]   ;;  %v3973_v1 = vld [vmem:[#allocation10 + $0xb8] sm:$0xff]  }
 0x1d1   :  { %v1681_v6 = vadd.f32 %v1680_v0, %v1638_v3  ;;  %v1689_v7 = vmax.f32 %v1679_v2, 0.0  ;;  %3403 = vmatprep.subr.bf16.mxu0 %v3958_v19  ;;  %v3969_v60 = vld [vmem:[#allocation10 + $0x8] sm:$0xff]   ;;  %v3972_v0 = vld [vmem:[#allocation10 + $0xf8] sm:$0xff]   ;;  %v3974_v2 = vld [vmem:[#allocation10 + $0xf0] sm:$0xff]  }
 0x1d2   :  { %v3975_v3 = vld [vmem:[#allocation10 + $0xb0] sm:$0xff]   ;;  %v3987_v18 = vld [vmem:[#allocation10 + $0x80] sm:$0xff]  }
 0x1d3   :  { %v1690_v10 = vmax.f32 %v1681_v6, 0.0  ;;  %v4236_v15 = vpack.c.bf16 %v1689_v7, %v1685_v12  ;;  %v3977_v6 = vld [vmem:[#allocation10 + $0xa8] sm:$0xff]   ;;  %v3978_v7 = vld [vmem:[#allocation10 + $0xe0] sm:$0xff]   ;;  %v3981_v12 = vld [vmem:[#allocation10 + $0x98] sm:$0xff]  }
 0x1d4   :  { %3404 = vmatpush3.bf16.msra.mxu0 %v3959_v21 }
 0x1d5   :  { %v1694_v13 = vpack.c.bf16 %v1690_v10, %v1686_v8  ;;  %3405 = vmatprep.subr.bf16.mxu0 %v3960_v22  ;;  %v3979_v8 = vld [vmem:[#allocation10 + $0xa0] sm:$0xff]   ;;  %v3980_v10 = vld [vmem:[#allocation10 + $0xd8] sm:$0xff]  }
 0x1d7   :  { %2560 = vmatprep.mubr.bf16.mxu1 %v1694_v13 }
 0x1d8   :  { %2561 = vmatmul.mubr.bf16.vlgmr.msra.gmra.mxu1 %v4236_v15  ;;  %3406 = vmatpush3.bf16.msra.mxu0 %v3961_v26 }
 0x1d9   :  { %2615 = vmatpush1.bf16.msra.mxu1 %v3908_v14  ;;  %2646 = vmatprep.mubr.bf16.mxu1 %v1694_v13  ;;  %v3982_v13 = vld [vmem:[#allocation10 + $0xd0] sm:$0xff]  }
 0x1da   :  { %2616 = vmatprep.subr.bf16.mxu1 %v3913_v16  ;;  %3407 = vmatprep.subr.bf16.mxu0 %v3962_v54  ;;  %v3983_v14 = vld [vmem:[#allocation10 + $0x90] sm:$0xff]   ;;  %v3985_v16 = vld [vmem:[#allocation10 + $0x88] sm:$0xff]  }
 0x1dc   :  { %3408 = vmatpush3.bf16.msra.mxu0 %v3963_v51 }
 0x1dd   :  { %2617 = vmatpush1.bf16.msra.mxu1 %v3911_v20  ;;  %3409 = vmatprep.subr.bf16.mxu0 %v3964_v55 }
 0x1de   :  { %2618 = vmatprep.subr.bf16.mxu1 %v3916_v63  ;;  %v1823_v63 = vld [vmem:[%s4261_s4] sm:$0xf] }
 0x1df   :  { %v1832_v22 = vrot.slane %v1823_v63, %v306_v11 }
 0x1e0   :  { %3410 = vmatpush3.bf16.msra.mxu0 %v3965_v56 }
 0x1e1   :  { %2619 = vmatpush1.bf16.msra.mxu1 %v3914_v23  ;;  %3411 = vmatprep.subr.bf16.mxu0 %v3966_v57  ;;  %v1828_v23 = vrot.slane %v1823_v63, %v302_v27 }
 0x1e2   :  { %2620 = vmatprep.subr.bf16.mxu1 %v3919_v25 }
 0x1e4   :  { %3412 = vmatpush3.bf16.msra.mxu0 %v3967_v58 }
 0x1e5   :  { %2621 = vmatpush1.bf16.msra.mxu1 %v3917_v28  ;;  %3413 = vmatprep.subr.bf16.mxu0 %v3968_v59 }
 0x1e6   :  { %2622 = vmatprep.subr.bf16.mxu1 %v3922_v9 }
 0x1e8   :  { %3414 = vmatpush3.bf16.msra.mxu0 %v3969_v60 }
 0x1e9   :  { %2623 = vmatpush1.bf16.msra.mxu1 %v3920_v29  ;;  %3415 = vmatprep.subr.bf16.mxu0 %v3970_v61 }
 0x1ea   :  { %2624 = vmatprep.subr.bf16.mxu1 %v3925_v30 }
 0x1ec   :  { %3416 = vmatpush3.bf16.msra.mxu0 %v3971_v62 }
 0x1ed   :  { %2625 = vmatpush1.bf16.msra.mxu1 %v3923_v32 }
 0x1ee   :  { %2626 = vmatprep.subr.bf16.mxu1 %v3928_v34 }
 0x1f1   :  { %2627 = vmatpush1.bf16.msra.mxu1 %v3926_v35 }
 0x1f2   :  { %2628 = vmatprep.subr.bf16.mxu1 %v3931_v33 }
 0x1f5   :  { %2629 = vmatpush1.bf16.msra.mxu1 %v3929_v36 }
 0x1f6   :  { %2630 = vmatprep.subr.bf16.mxu1 %v3934_v37 }
 0x1f9   :  { %2631 = vmatpush2.bf16.msra.mxu1 %v3932_v38 }
 0x1fa   :  { %2632 = vmatprep.subr.bf16.mxu1 %v3937_v39 }
 0x1fd   :  { %2633 = vmatpush2.bf16.msra.mxu1 %v3935_v40 }
 0x1fe   :  { %2634 = vmatprep.subr.bf16.mxu1 %v3940_v41 }
 0x201   :  { %2635 = vmatpush2.bf16.msra.mxu1 %v3938_v42 }
 0x202   :  { %2636 = vmatprep.subr.bf16.mxu1 %v3943_v43 }
 0x205   :  { %2637 = vmatpush2.bf16.msra.mxu1 %v3941_v44 }
 0x206   :  { %2638 = vmatprep.subr.bf16.mxu1 %v3946_v45 }
 0x209   :  { %2639 = vmatpush2.bf16.msra.mxu1 %v3944_v46  ;;  %v1840_v46 = vrot.slane %v1823_v63, %v314_v4 }
 0x20a   :  { %2640 = vmatprep.subr.bf16.mxu1 %v3949_v47  ;;  %v1836_v47 = vrot.slane %v1823_v63, %v310_v31 }
 0x20d   :  { %2641 = vmatpush2.bf16.msra.mxu1 %v3947_v48 }
 0x20e   :  { %2642 = vmatprep.subr.bf16.mxu1 %v3952_v49 }
 0x211   :  { %2643 = vmatpush2.bf16.msra.mxu1 %v3950_v50 }
 0x212   :  { %2644 = vmatprep.subr.bf16.mxu1 %v3955_v52 }
 0x215   :  { %2645 = vmatpush2.bf16.msra.mxu1 %v3953_v53 }
 0x216   :  { %3423 = vmatprep.subr.bf16.mxu1 %v3972_v0 }
 0x218   :  { %2647 = vmatmul.mubr.bf16.vlgmr.msra.gmra.mxu1 %v4236_v15  ;;  %v3984_v15 = vld [vmem:[#allocation10 + $0xc8] sm:$0xff]  }
 0x219   :  { %3424 = vmatpush3.bf16.msra.mxu1 %v3973_v1 }
 0x21a   :  { %3425 = vmatprep.subr.bf16.mxu1 %v3974_v2 }
 0x21d   :  { %3426 = vmatpush3.bf16.msra.mxu1 %v3975_v3 }
 0x21e   :  { %3427 = vmatprep.subr.bf16.mxu1 %v3976_v5 }
 0x221   :  { %3428 = vmatpush3.bf16.msra.mxu1 %v3977_v6  ;;  %v3368_v6 = vld [vmem:[%s4263_s6] ss:$0 sm:$0xff] }
 0x222   :  { %3429 = vmatprep.subr.bf16.mxu1 %v3978_v7 }
 0x225   :  { %3430 = vmatpush3.bf16.msra.mxu1 %v3979_v8 }
 0x226   :  { %3431 = vmatprep.subr.bf16.mxu1 %v3980_v10 }
 0x229   :  { %3432 = vmatpush3.bf16.msra.mxu1 %v3981_v12 }
 0x22a   :  { %3433 = vmatprep.subr.bf16.mxu1 %v3982_v13 }
 0x22d   :  { %3434 = vmatpush3.bf16.msra.mxu1 %v3983_v14 }
 0x22e   :  { %3435 = vmatprep.subr.bf16.mxu1 %v3984_v15 }
 0x231   :  { %3436 = vmatpush3.bf16.msra.mxu1 %v3985_v16 }
 0x232   :  { %3437 = vmatprep.subr.bf16.mxu1 %v3986_v17 }
 0x235   :  { %3438 = vmatpush3.bf16.msra.mxu1 %v3987_v18 }
 0x24f   :  { %v2519_v19 = vpop.f32.mrf.mxu0 }
 0x250   :  { %v2520_v30 = vadd.f32 %v2519_v19, %v1828_v23 }
 0x251   :  { %v2521_v20 = vpop.f32.mrf.mxu0 }
 0x252   :  { %v2522_v9 = vadd.f32 %v2521_v20, %v1832_v22 }
 0x253   :  { %v2523_v21 = vpop.f32.mrf.mxu0 }
 0x254   :  { %v2524_v29 = vadd.f32 %v2523_v21, %v1828_v23 }
 0x255   :  { %v2525_v26 = vpop.f32.mrf.mxu0 }
 0x256   :  { %v2526_v34 = vadd.f32 %v2525_v26, %v1832_v22 }
 0x28f   :  { %v2605_v27 = vpop.f32.mrf.mxu0 }
 0x290   :  { %v2606_v54 = vadd.f32 %v2605_v27, %v1836_v47 }
 0x291   :  { %v2607_v44 = vpop.f32.mrf.mxu0 }
 0x292   :  { %v2608_v52 = vadd.f32 %v2607_v44, %v1840_v46 }
 0x293   :  { %v2609_v45 = vpop.f32.mrf.mxu0 }
 0x294   :  { %v2610_v53 = vadd.f32 %v2609_v45, %v1836_v47 }
 0x295   :  { %v2611_v49 = vpop.f32.mrf.mxu0 }
 0x296   :  { %v2612_v55 = vadd.f32 %v2611_v49, %v1840_v46 }
 0x298   :  { %v2562_v25 = vpop.f32.mrf.mxu1 }
 0x299   :  { %v2563_v36 = vadd.f32 %v2562_v25, %v2520_v30 }
 0x29a   :  { %v2564_v28 = vpop.f32.mrf.mxu1 }
 0x29b   :  { %v2565_v35 = vadd.f32 %v2564_v28, %v2522_v9  ;;  %v2657_v11 = vmax.f32 %v2563_v36, 0.0 }
 0x29c   :  { %v2566_v32 = vpop.f32.mrf.mxu1 }
 0x29d   :  { %v2567_v33 = vadd.f32 %v2566_v32, %v2524_v29  ;;  %v2658_v40 = vmax.f32 %v2565_v35, 0.0 }
 0x29e   :  { %v2568_v37 = vpop.f32.mrf.mxu1 }
 0x29f   :  { %v2569_v38 = vadd.f32 %v2568_v37, %v2526_v34  ;;  %v2661_v39 = vmax.f32 %v2567_v33, 0.0 }
 0x2a1   :  { %v2662_v41 = vmax.f32 %v2569_v38, 0.0  ;;  %v2665_v43 = vpack.c.bf16 %v2661_v39, %v2657_v11 }
 0x2a3   :  { %v2666_v42 = vpack.c.bf16 %v2662_v41, %v2658_v40 }
 0x2a5   :  { %2964 = vmatprep.mubr.bf16.mxu0 %v2666_v42 }
 0x2a6   :  { %2965 = vmatmul.mubr.bf16.vlgmr.msra.gmra.mxu0 %v2665_v43 }
 0x2d8   :  { %v2648_v48 = vpop.f32.mrf.mxu1 }
 0x2d9   :  { %v2649_v58 = vadd.f32 %v2648_v48, %v2606_v54 }
 0x2da   :  { %v2650_v50 = vpop.f32.mrf.mxu1 }
 0x2db   :  { %v2651_v56 = vadd.f32 %v2650_v50, %v2608_v52  ;;  %v2659_v4 = vmax.f32 %v2649_v58, 0.0 }
 0x2dc   :  { %v2652_v51 = vpop.f32.mrf.mxu1 }
 0x2dd   :  { %v2653_v57 = vadd.f32 %v2652_v51, %v2610_v53  ;;  %v2660_v62 = vmax.f32 %v2651_v56, 0.0 }
 0x2de   :  { %v2654_v59 = vpop.f32.mrf.mxu1 }
 0x2df   :  { %v2655_v60 = vadd.f32 %v2654_v59, %v2612_v55  ;;  %v2663_v61 = vmax.f32 %v2653_v57, 0.0 }
 0x2e1   :  { %v2664_v0 = vmax.f32 %v2655_v60, 0.0  ;;  %v2667_v24 = vpack.c.bf16 %v2663_v61, %v2659_v4 }
 0x2e3   :  { %v2668_v1 = vpack.c.bf16 %v2664_v0, %v2660_v62 }
 0x2e5   :  { %3005 = vmatprep.mubr.bf16.mxu1 %v2668_v1 }
 0x2e6   :  { %3006 = vmatmul.mubr.bf16.vlgmr.msra.gmra.mxu1 %v2667_v24 }
 0x366   :  { %v3417_v31 = vpop.f32.mrf.mxu0 }
 0x368   :  { %v3418_v2 = vpop.f32.mrf.mxu0 }
 0x369   :  { %v3419_v5 = vadd.f32 %v3418_v2, %v3417_v31 }
 0x36a   :  { %v3420_v3 = vpop.f32.mrf.mxu0 }
 0x36b   :  { %v2967_v12 = vadd.f32 %v3419_v5, %v3368_v6 }
 0x36c   :  { %v3421_v7 = vpop.f32.mrf.mxu0 }
 0x36d   :  { %v3422_v13 = vadd.f32 %v3421_v7, %v3420_v3 }
 0x36f   :  { %v2970_v18 = vadd.f32 %v3422_v13, %v3368_v6 }
 0x3a6   :  { %v3439_v8 = vpop.f32.mrf.mxu1 }
 0x3a8   :  { %v3440_v10 = vpop.f32.mrf.mxu1 }
 0x3a9   :  { %v3441_v14 = vadd.f32 %v3440_v10, %v3439_v8 }
 0x3aa   :  { %v3442_v15 = vpop.f32.mrf.mxu1 }
 0x3ab   :  { %v3008_v16 = vadd.f32 %v3441_v14, %v2967_v12 }
 0x3ac   :  { %v3443_v17 = vpop.f32.mrf.mxu1 }
 0x3ad   :  { %3014 = vst [vmem:[#allocation11] sm:$0xff] %v3008_v16  ;;  %v3444_v19 = vadd.f32 %v3443_v17, %v3442_v15 }
 0x3af   :  { %v3011_v20 = vadd.f32 %v3444_v19, %v2970_v18 }
 0x3b1   :  { %3015 = vst [vmem:[#allocation11 + $0x8] sm:$0xff] %v3011_v20 }
 0x3b2   :  { %4101 = shalt.err (!%p4098_p1)
}
 0x3b3   :  { %s4131_s6 = smov 128   ;;  %s4132_s10 = smov 8  }
 0x3b4   :  { %3027 = dma.vmem_to_hbm [thread:$0]  %s3022_s8, 256, %s4264_s7, [#allocation4], %s4131_s6, %s4131_s6, %s4132_s10  }
 0x3b5   :  { %4116 = dma.done.wait [#allocation4], 256  }
 0x3b6   :  { %4117 = vsyncadd [#allocation4], 4294967040 }
 0x3b7   :  { %3031 = vsyncpa [#allocation3], 1 }
 0x3b8   :  { %3032 = vsyncpa [#allocation6], 1 }
 0x3b9   :  { %3033 = vsyncpa [#allocation9], 1 }
 0x3ba   :  { %3034 = vsyncpa [#allocation4], 1 }

</bundles_post_ra>
